<compile_context>
chip_gen: v7x
topology: tpu7x:2x2x1
jax: 0.10.0
libtpu: 0.0.40
codegen_flags: <defaults>
</compile_context>

<pallas_src>
import functools

import jax
import jax.numpy as jnp
from jax import lax
from jax.experimental import pallas as pl
from jax.experimental.pallas import tpu as pltpu

C_OUT = 1280     # MobileNetV2 final feature width (Linear in_features)
N_CLS = 10       # NIMA score buckets
LANE_PAD = 128   # head output padded to a full 128-lane register


def _nima_kernel(x_ref, wpw_ref, bpw_ref, wfc_ref, bfc_ref, o_ref, feat_ref,
                 *, inv_hw, tb):
    # Resident weights (constant index_map -> stay in VMEM across grid steps).
    w_pw = wpw_ref[...]                                   # (C, 1280) bf16
    b_pw = bpw_ref[...]                                   # (1, 1280) f32

    # ---- base-model tail: 1x1 pointwise conv + ReLU6 + global average pool ----
    # TB images per grid step (statically unrolled).  Each x slab is the raw
    # NCHW (C, HW) tile: contract over C directly (transposed-LHS MXU feed), so
    # no NHWC transpose / extra HBM pass is ever done on x.
    for b in range(tb):
        xb = x_ref[b].astype(jnp.bfloat16)                # (C, HW) bf16 MXU feed
        y = lax.dot_general(
            xb, w_pw,                                     # (C, HW) x (C, 1280)
            dimension_numbers=(((0,), (0,)), ((), ())),
            preferred_element_type=jnp.float32)           # (HW, 1280) f32 acc
        y = jnp.clip(y + b_pw, 0.0, 6.0)                  # bias + ReLU6 (f32)
        # Global average pool as sum * (1/HW): constant multiply, no VPU divide.
        feat_ref[pl.ds(b, 1), :] = jnp.sum(y, axis=0, keepdims=True) * inv_hw

    # ---- head, fused & batched over TB:
    #      ReLU (no-op: mean of ReLU6 outputs >= 0) -> Dropout (identity, eval)
    #      -> Linear(1280, 10) -> Softmax(dim=1) ----
    feat = feat_ref[...]                                  # (TB, 1280) f32
    logits = jnp.dot(feat.astype(jnp.bfloat16), wfc_ref[...],
                     preferred_element_type=jnp.float32) + bfc_ref[...]  # (TB,128)
    # Pad lanes 10..127 carry zero weight and -1e30 bias -> exp() underflows to
    # 0 exactly, so the 128-lane softmax equals the 10-class softmax.
    m = jnp.max(logits, axis=-1, keepdims=True)
    e = jnp.exp(logits - m)
    inv_den = pl.reciprocal(jnp.sum(e, axis=-1, keepdims=True), approx=True)
    o_ref[0] = e * inv_den                                # (TB, 128) dense store


def nima_forward(x_nchw, w_pw, b_pw, w_fc, b_fc):
    B, C, H, W = x_nchw.shape
    HW = H * W
    # Free reshape of the NCHW activation (no transpose / HBM round-trip).
    x3 = x_nchw.reshape(B, C, HW)

    # TB images per grid step; keep >= 2 grid steps (when B >= 2) so v7x's two
    # TensorCores both get work under dimension_semantics=("parallel",).
    TB = max(1, min(8, pl.cdiv(B, 2)))
    G = pl.cdiv(B, TB)
    B_pad = G * TB
    if B_pad != B:
        # Zero-padded images produce finite (garbage) rows that are sliced off.
        x3 = jnp.pad(x3, ((0, B_pad - B), (0, 0), (0, 0)))

    # Weights to bf16 (MXU-native); biases and all epilogue math stay f32.
    # x stays f32 in HBM and is cast to bf16 in-kernel (a wrapper astype would
    # add a full extra HBM pass over x).
    w_pw_bf = w_pw.astype(jnp.bfloat16)                   # (C, 1280)
    b_pw_f = b_pw.reshape(1, C_OUT).astype(jnp.float32)   # (1, 1280)

    # Head weights padded 10 -> 128 lanes for a lane-dense kernel output.
    w_fc_p = jnp.zeros((C_OUT, LANE_PAD), jnp.bfloat16)
    w_fc_p = w_fc_p.at[:, :N_CLS].set(w_fc.astype(jnp.bfloat16))
    b_fc_p = jnp.full((1, LANE_PAD), -1e30, jnp.float32)
    b_fc_p = b_fc_p.at[:, :N_CLS].set(b_fc.reshape(1, N_CLS).astype(jnp.float32))

    kernel = functools.partial(_nima_kernel, inv_hw=1.0 / HW, tb=TB)

    out_pad = pl.pallas_call(
        kernel,
        out_shape=jax.ShapeDtypeStruct((G, TB, LANE_PAD), jnp.float32),
        grid=(G,),
        in_specs=[
            pl.BlockSpec((TB, C, HW), lambda i: (i, 0, 0)),      # x   (f32 slab)
            pl.BlockSpec((C, C_OUT), lambda i: (0, 0)),          # w_pw (bf16, resident)
            pl.BlockSpec((1, C_OUT), lambda i: (0, 0)),          # b_pw (f32)
            pl.BlockSpec((C_OUT, LANE_PAD), lambda i: (0, 0)),   # w_fc padded (bf16)
            pl.BlockSpec((1, LANE_PAD), lambda i: (0, 0)),       # b_fc padded (f32)
        ],
        out_specs=pl.BlockSpec((1, TB, LANE_PAD), lambda i: (i, 0, 0)),
        scratch_shapes=[pltpu.VMEM((TB, C_OUT), jnp.float32)],   # stacked GAP feats
        compiler_params=pltpu.CompilerParams(
            dimension_semantics=("parallel",),   # megacore: split steps across TCs
            vmem_limit_bytes=32 * 1024 * 1024,
        ),
    )(x3, w_pw_bf, b_pw_f, w_fc_p, b_fc_p)

    # (G, TB, 128) -> (B_pad, 128) is a contiguous (free) reshape; drop padding
    # rows and padded lanes -> (B, 10) softmax probabilities.
    return out_pad.reshape(B_pad, LANE_PAD)[:B, :N_CLS]


def _nima_reference(x, w_pw, b_pw, w_fc, b_fc):
    """Pure-JAX f32 reference of the same forward (eval mode)."""
    y = jnp.einsum("bchw,cn->bhwn", x, w_pw) + b_pw          # 1x1 pointwise conv
    y = jnp.clip(y, 0.0, 6.0)                                # ReLU6
    feat = jnp.mean(y, axis=(1, 2))                          # global average pool
    h = jax.nn.relu(feat)                                    # head ReLU (no-op)
    logits = h @ w_fc + b_fc                                 # Dropout = identity
    return jax.nn.softmax(logits, axis=1)


if __name__ == "__main__":
    key = jax.random.PRNGKey(0)
    kx, kw1, kb1, kw2, kb2 = jax.random.split(key, 5)

    # Small, shape-consistent example: B=4, C_in=32, spatial 8x8.
    B, C, H, W = 4, 32, 8, 8
    x = jax.random.normal(kx, (B, C, H, W), jnp.float32)

    # Deterministic synthetic parameters (shapes from the module definition).
    w_pw = jax.random.normal(kw1, (C, C_OUT), jnp.float32) * 0.05     # 1x1 conv weight
    b_pw = jax.random.normal(kb1, (C_OUT,), jnp.float32) * 0.01       # 1x1 conv bias
    w_fc = jax.random.normal(kw2, (C_OUT, N_CLS), jnp.float32) * 0.02  # Linear(1280,10)
    b_fc = jax.random.normal(kb2, (N_CLS,), jnp.float32) * 0.01

    out = jax.jit(nima_forward)(x, w_pw, b_pw, w_fc, b_fc)
    out = jax.block_until_ready(out)

    ref = _nima_reference(x, w_pw, b_pw, w_fc, b_fc)

    assert out.shape == (B, N_CLS), out.shape
    assert bool(jnp.all(jnp.isfinite(out)))
    # Approx-reciprocal softmax + bf16 matmuls -> loose tolerances.
    assert bool(jnp.allclose(jnp.sum(out, axis=1), 1.0, atol=1e-2))
    assert bool(jnp.max(jnp.abs(out - ref)) < 3e-2), float(jnp.max(jnp.abs(out - ref)))
    print("KERNEL_OK")
</pallas_src>

<mosaic_0001>
module attributes {stable_mosaic.version = 11 : i64} {
  func.func @_nima_kernel(%arg0: i32, %arg1: memref<2x32x64xf32, #tpu.memory_space<vmem>>, %arg2: memref<32x1280xbf16, #tpu.memory_space<vmem>>, %arg3: memref<1x1280xf32, #tpu.memory_space<vmem>>, %arg4: memref<1280x128xbf16, #tpu.memory_space<vmem>>, %arg5: memref<1x128xf32, #tpu.memory_space<vmem>>, %arg6: memref<1x2x128xf32, #tpu.memory_space<vmem>>, %arg7: memref<2x1280xf32, #tpu.memory_space<vmem>>) attributes {dimension_semantics = [#tpu.dimension_semantics<parallel>], iteration_bounds = array<i64: 2>, scalar_prefetch = 0 : i64, scratch_operands = 1 : i64, tpu.core_type = #tpu.core_type<tc>, window_params = [{transform_indices = @transform_0, window_bounds = array<i64: 2, 32, 64>}, {pipeline_mode = #tpu.pipeline_mode<synchronous>, transform_indices = @transform_1, window_bounds = array<i64: 32, 1280>}, {pipeline_mode = #tpu.pipeline_mode<synchronous>, transform_indices = @transform_2, window_bounds = array<i64: 1, 1280>}, {pipeline_mode = #tpu.pipeline_mode<synchronous>, transform_indices = @transform_3, window_bounds = array<i64: 1280, 128>}, {pipeline_mode = #tpu.pipeline_mode<synchronous>, transform_indices = @transform_4, window_bounds = array<i64: 1, 128>}, {transform_indices = @transform_5, window_bounds = array<i64: 1, 2, 128>}]} {
    %c0 = arith.constant 0 : index
    %c0_0 = arith.constant 0 : index
    %0 = vector.load %arg2[%c0, %c0_0] : memref<32x1280xbf16, #tpu.memory_space<vmem>>, vector<32x1280xbf16>
    %c0_1 = arith.constant 0 : index
    %c0_2 = arith.constant 0 : index
    %1 = vector.load %arg3[%c0_1, %c0_2] : memref<1x1280xf32, #tpu.memory_space<vmem>>, vector<1x1280xf32>
    %c0_3 = arith.constant 0 : index
    %c0_4 = arith.constant 0 : index
    %c0_5 = arith.constant 0 : index
    %2 = vector.load %arg1[%c0_3, %c0_4, %c0_5] : memref<2x32x64xf32, #tpu.memory_space<vmem>>, vector<1x32x64xf32>
    %3 = vector.shape_cast %2 : vector<1x32x64xf32> to vector<32x64xf32>
    %4 = arith.truncf %3 : vector<32x64xf32> to vector<32x64xbf16>
    %cst = arith.constant dense<0.000000e+00> : vector<64x1280xf32>
    %5 = tpu.matmul %4, %0, %cst {dimension_numbers = #tpu.dot_dimension_numbers<[0], [0], [1], [1], [0, 1, 1, 1], [], []>} : vector<32x64xbf16>, vector<32x1280xbf16>, vector<64x1280xf32> -> vector<64x1280xf32>
    %6 = vector.broadcast %1 : vector<1x1280xf32> to vector<64x1280xf32>
    %7 = arith.addf %5, %6 : vector<64x1280xf32>
    %cst_6 = arith.constant 0.000000e+00 : f32
    %cst_7 = arith.constant 6.000000e+00 : f32
    %8 = vector.broadcast %cst_6 : f32 to vector<64x1280xf32>
    %9 = arith.maximumf %8, %7 : vector<64x1280xf32>
    %10 = vector.broadcast %cst_7 : f32 to vector<64x1280xf32>
    %11 = arith.minimumf %10, %9 : vector<64x1280xf32>
    %cst_8 = arith.constant dense<0.000000e+00> : vector<1280xf32>
    %12 = vector.multi_reduction <add>, %11, %cst_8 [0] : vector<64x1280xf32> to vector<1280xf32>
    %13 = vector.shape_cast %12 : vector<1280xf32> to vector<1x1280xf32>
    %cst_9 = arith.constant 1.562500e-02 : f32
    %14 = vector.broadcast %cst_9 : f32 to vector<1x1280xf32>
    %15 = arith.mulf %13, %14 : vector<1x1280xf32>
    %c0_10 = arith.constant 0 : index
    %c0_11 = arith.constant 0 : index
    %16 = vector.load %arg7[%c0_10, %c0_11] : memref<2x1280xf32, #tpu.memory_space<vmem>>, vector<1x1280xf32>
    tpu.vector_store %arg7[%c0_10, %c0_11], %15 {strides = array<i32>} : memref<2x1280xf32, #tpu.memory_space<vmem>>, vector<1x1280xf32>,
    %c1 = arith.constant 1 : index
    %c0_12 = arith.constant 0 : index
    %c0_13 = arith.constant 0 : index
    %17 = vector.load %arg1[%c1, %c0_12, %c0_13] : memref<2x32x64xf32, #tpu.memory_space<vmem>>, vector<1x32x64xf32>
    %18 = vector.shape_cast %17 : vector<1x32x64xf32> to vector<32x64xf32>
    %19 = arith.truncf %18 : vector<32x64xf32> to vector<32x64xbf16>
    %cst_14 = arith.constant dense<0.000000e+00> : vector<64x1280xf32>
    %20 = tpu.matmul %19, %0, %cst_14 {dimension_numbers = #tpu.dot_dimension_numbers<[0], [0], [1], [1], [0, 1, 1, 1], [], []>} : vector<32x64xbf16>, vector<32x1280xbf16>, vector<64x1280xf32> -> vector<64x1280xf32>
    %21 = vector.broadcast %1 : vector<1x1280xf32> to vector<64x1280xf32>
    %22 = arith.addf %20, %21 : vector<64x1280xf32>
    %cst_15 = arith.constant 0.000000e+00 : f32
    %cst_16 = arith.constant 6.000000e+00 : f32
    %23 = vector.broadcast %cst_15 : f32 to vector<64x1280xf32>
    %24 = arith.maximumf %23, %22 : vector<64x1280xf32>
    %25 = vector.broadcast %cst_16 : f32 to vector<64x1280xf32>
    %26 = arith.minimumf %25, %24 : vector<64x1280xf32>
    %cst_17 = arith.constant dense<0.000000e+00> : vector<1280xf32>
    %27 = vector.multi_reduction <add>, %26, %cst_17 [0] : vector<64x1280xf32> to vector<1280xf32>
    %28 = vector.shape_cast %27 : vector<1280xf32> to vector<1x1280xf32>
    %cst_18 = arith.constant 1.562500e-02 : f32
    %29 = vector.broadcast %cst_18 : f32 to vector<1x1280xf32>
    %30 = arith.mulf %28, %29 : vector<1x1280xf32>
    %c1_19 = arith.constant 1 : index
    %c0_20 = arith.constant 0 : index
    %31 = vector.load %arg7[%c1_19, %c0_20] : memref<2x1280xf32, #tpu.memory_space<vmem>>, vector<1x1280xf32>
    tpu.vector_store %arg7[%c1_19, %c0_20], %30 {strides = array<i32>} : memref<2x1280xf32, #tpu.memory_space<vmem>>, vector<1x1280xf32>,
    %c0_21 = arith.constant 0 : index
    %c0_22 = arith.constant 0 : index
    %32 = vector.load %arg7[%c0_21, %c0_22] : memref<2x1280xf32, #tpu.memory_space<vmem>>, vector<2x1280xf32>
    %33 = arith.truncf %32 : vector<2x1280xf32> to vector<2x1280xbf16>
    %c0_23 = arith.constant 0 : index
    %c0_24 = arith.constant 0 : index
    %34 = vector.load %arg4[%c0_23, %c0_24] : memref<1280x128xbf16, #tpu.memory_space<vmem>>, vector<1280x128xbf16>
    %cst_25 = arith.constant dense<0.000000e+00> : vector<2x128xf32>
    %35 = tpu.matmul %33, %34, %cst_25 {dimension_numbers = #tpu.dot_dimension_numbers<[1], [0], [0], [1], [0, 0, 1, 1], [], []>} : vector<2x1280xbf16>, vector<1280x128xbf16>, vector<2x128xf32> -> vector<2x128xf32>
    %c0_26 = arith.constant 0 : index
    %c0_27 = arith.constant 0 : index
    %36 = vector.load %arg5[%c0_26, %c0_27] : memref<1x128xf32, #tpu.memory_space<vmem>>, vector<1x128xf32>
    %37 = vector.broadcast %36 : vector<1x128xf32> to vector<2x128xf32>
    %38 = arith.addf %35, %37 : vector<2x128xf32>
    %cst_28 = arith.constant dense<0xFF800000> : vector<2xf32>
    %39 = vector.multi_reduction <maximumf>, %38, %cst_28 [1] : vector<2x128xf32> to vector<2xf32>
    %40 = vector.shape_cast %39 : vector<2xf32> to vector<2x1xf32>
    %41 = vector.broadcast %40 : vector<2x1xf32> to vector<2x128xf32>
    %42 = arith.subf %38, %41 : vector<2x128xf32>
    %43 = math.exp %42 : vector<2x128xf32>
    %cst_29 = arith.constant dense<0.000000e+00> : vector<2xf32>
    %44 = vector.multi_reduction <add>, %43, %cst_29 [1] : vector<2x128xf32> to vector<2xf32>
    %45 = vector.shape_cast %44 : vector<2xf32> to vector<2x1xf32>
    %46 = tpu.reciprocal %45 {approx = true} : vector<2x1xf32> -> vector<2x1xf32>
    %47 = vector.broadcast %46 : vector<2x1xf32> to vector<2x128xf32>
    %48 = arith.mulf %43, %47 : vector<2x128xf32>
    %c0_30 = arith.constant 0 : index
    %c0_31 = arith.constant 0 : index
    %c0_32 = arith.constant 0 : index
    %49 = vector.load %arg6[%c0_30, %c0_31, %c0_32] : memref<1x2x128xf32, #tpu.memory_space<vmem>>, vector<1x2x128xf32>
    %50 = vector.shape_cast %49 : vector<1x2x128xf32> to vector<2x128xf32>
    %51 = vector.shape_cast %48 : vector<2x128xf32> to vector<1x2x128xf32>
    tpu.vector_store %arg6[%c0_30, %c0_31, %c0_32], %51 {strides = array<i32>} : memref<1x2x128xf32, #tpu.memory_space<vmem>>, vector<1x2x128xf32>,
    return
  }
  func.func @transform_0(%arg0: i32) -> (i32, i32, i32) {
    %c0_i32 = arith.constant 0 : i32
    %c0_i32_0 = arith.constant 0 : i32
    %c0_i32_1 = arith.constant 0 : i32
    return %arg0, %c0_i32, %c0_i32_0 : i32, i32, i32
  }
  func.func @transform_1(%arg0: i32) -> (i32, i32) {
    %c0_i32 = arith.constant 0 : i32
    %c0_i32_0 = arith.constant 0 : i32
    %c0_i32_1 = arith.constant 0 : i32
    return %c0_i32, %c0_i32_0 : i32, i32
  }
  func.func @transform_2(%arg0: i32) -> (i32, i32) {
    %c0_i32 = arith.constant 0 : i32
    %c0_i32_0 = arith.constant 0 : i32
    %c0_i32_1 = arith.constant 0 : i32
    return %c0_i32, %c0_i32_0 : i32, i32
  }
  func.func @transform_3(%arg0: i32) -> (i32, i32) {
    %c0_i32 = arith.constant 0 : i32
    %c0_i32_0 = arith.constant 0 : i32
    %c0_i32_1 = arith.constant 0 : i32
    return %c0_i32, %c0_i32_0 : i32, i32
  }
  func.func @transform_4(%arg0: i32) -> (i32, i32) {
    %c0_i32 = arith.constant 0 : i32
    %c0_i32_0 = arith.constant 0 : i32
    %c0_i32_1 = arith.constant 0 : i32
    return %c0_i32, %c0_i32_0 : i32, i32
  }
  func.func @transform_5(%arg0: i32) -> (i32, i32, i32) {
    %c0_i32 = arith.constant 0 : i32
    %c0_i32_0 = arith.constant 0 : i32
    %c0_i32_1 = arith.constant 0 : i32
    return %arg0, %c0_i32, %c0_i32_0 : i32, i32, i32
  }
}

</mosaic_0001>

<bundles_post_ra>
// kernel: nima_forward.1
= control target key start
LH: loop header
LB: loop body
LE: loop exit
PB: predicated region body
PF: predicated region fallthrough
CT: control target
= control target key end

     0   :  { %10 = vsyncpa [#allocation4], 0  ;;  %s4612_s0 = inlined_call_operand.vmem [shape: f32[4,32,64], index: 0, kind: input, shape index: {}]   ;;  %s4613_s1 = inlined_call_operand.vmem [shape: bf16[32,1280], index: 1, kind: input, shape index: {}]   ;;  %s4614_s2 = inlined_call_operand.vmem [shape: f32[1,1280], index: 2, kind: input, shape index: {}]   ;;  %s4615_s3 = inlined_call_operand.vmem [shape: bf16[1280,128], index: 3, kind: input, shape index: {}]   ;;  %s4616_s4 = inlined_call_operand.vmem [shape: f32[1,128], index: 4, kind: input, shape index: {}]   ;;  %s4617_s5 = inlined_call_operand.hbm [shape: f32[2,2,128], index: 5, kind: output, shape index: {}]  }
   0x1   :  { %12 = vsyncpa [#allocation4 + $0x1], 0  ;;  %s3496_s18 = smov 0   ;;  %s3498_s19 = smov 0  }
   0x2   :  { %s3500_s20 = smov 0   ;;  %s3502_s21 = smov 0  }
   0x3 LB: > { %s3517_s22 = sadd.s32 4294967295, %s3460_s21   ;;  %s2967_s23 = sadd.s32 4294967294, %s3460_s21   ;;  %s3460_s21 = sphi %s3502_s21, %s4625_s21   ;;  %s3456_s20 = sphi %s3500_s20, %s4624_s20   ;;  %s3452_s19 = sphi %s3498_s19, %s4623_s19   ;;  %s3448_s18 = sphi %s3496_s18, %s4622_s18  }
   0x4   : > { %s3521_s24 = sadd.s32 1, %s3460_s21   ;;  %s135_s25 = sadd.s32 1, %s3456_s20 }
   0x5   : > { %s132_s26 = ssub.s32 %s3460_s21, %s3521_s24  ;;  %p145_p0 = scmp.ne.s32.totalorder %s3456_s20, %s3452_s19 }
   0x6   : > { %p133_p1 = scmp.eq.s32.totalorder %s132_s26, 0  ;;  %p146_p2 = scmp.eq.s32.totalorder %s3517_s22, 1 }
   0x7   : > { %p151_p3 = scmp.ne.s32.totalorder %s3452_s19, %s3448_s18  ;;  %p152_p4 = scmp.eq.s32.totalorder %s2967_s23, 1 }
   0x8   : > { %s3532_s27 = scalar_select %p133_p1, %s3456_s20, %s135_s25  }
   0x9   : > { %p3534_p5 = por %p146_p2, %p145_p0  ;;  %p3538_p6 = por %p152_p4, %p151_p3 }
   0xa   : > { %p2970_p7 = scmp.ge.s32.totalorder %s3460_s21, 1  ;;  %p192_p8 = scmp.lt.s32.totalorder %s3460_s21, 3 }
   0xc   : > { %p193_p9 = pnand %p2970_p7, %p192_p8 }
   0xd   : > { %s2972_s30 = sshll.u32 (!%p193_p9), %s3517_s22, 1  ;;  %v3548_v0 = vld [vmem:[%s4613_s1 + $0x4] ss:$40 sps:$4 sm:$0xff] (!%p193_p9)   ;;  %v3553_v1 = vld [vmem:[%s4613_s1] ss:$40 sps:$4 sm:$0xff] (!%p193_p9)   ;;  %v3462_v2 = vmov (!%p193_p9), 0   ;;  %v259_v41 = vlaneseq (!%p193_p9) }
   0xe   : > { %196 = sbr.rel (%p193_p9) target bundleno = 1171 (0x493), region = 40  ;;  %p222_p10 = scmp.lt.s32.totalorder (!%p193_p9), %s2972_s30, 3  ;;  %470 = vmatprep.mubr.bf16.mxu0 (!%p193_p9), %v3462_v2  ;;  %490 = vmatprep.mubr.bf16.mxu1 (!%p193_p9), %v3462_v2  ;;  %v3561_v3 = vld [vmem:[%s4613_s1 + $0x54] ss:$40 sps:$4 sm:$0xff] (!%p193_p9)   ;;  %v3568_v4 = vld [vmem:[%s4613_s1 + $0x50] ss:$40 sps:$4 sm:$0xff] (!%p193_p9)  }
   0xf   : > { %438 = vmatprep.subr.bf16.mxu0 (!%p193_p9), %v3548_v0  ;;  %3236 = vmatprep.subr.bf16.mxu1 (!%p193_p9), %v3548_v0  ;;  %v3290_v5 = vld [vmem:[%s4613_s1 + $0xc] ss:$40 sps:$4 sm:$0xff] (!%p193_p9)   ;;  %vm425_vm0 = vcmask (!%p193_p9), 261120   ;;  %v3590_v19 = vld [vmem:[%s4613_s1 + $0x10] ss:$40 sps:$4 sm:$0xff] (!%p193_p9)   ;;  %v3748_v42 = vshrl.u32 (!%p193_p9), %v259_v41, 7 }
  0x10   : > { %439 = vmatpush1.bf16.msra.mxu0 (!%p193_p9), %v3553_v1  ;;  %3238 = vmatpush1.bf16.msra.mxu1 (!%p193_p9), %v3553_v1  ;;  %v3579_v6 = vld [vmem:[%s4613_s1 + $0x14] ss:$40 sps:$4 sm:$0xff] (!%p193_p9)   ;;  %v3595_v20 = vld [vmem:[%s4613_s1 + $0x64] ss:$40 sps:$4 sm:$0xff] (!%p193_p9)   ;;  %v3603_v22 = vld [vmem:[%s4613_s1 + $0x60] ss:$40 sps:$4 sm:$0xff] (!%p193_p9)  }
  0x11   : > { %440 = vmatprep.subr.bf16.mxu0 (!%p193_p9), %v3561_v3  ;;  %3237 = vmatprep.subr.bf16.mxu1 (!%p193_p9), %v3561_v3  ;;  %v3609_v23 = vld [vmem:[%s4613_s1 + $0x24] ss:$40 sps:$4 sm:$0xff] (!%p193_p9)   ;;  %v3288_v25 = vld [vmem:[%s4613_s1 + $0x8] ss:$40 sps:$4 sm:$0xff] (!%p193_p9)   ;;  %v3297_v28 = vld [vmem:[%s4613_s1 + $0x58] ss:$40 sps:$4 sm:$0xff] (!%p193_p9)  }
  0x12   : > { %v3299_v26 = vld [vmem:[%s4613_s1 + $0x5c] ss:$40 sps:$4 sm:$0xff] (!%p193_p9)   ;;  %v3635_v31 = vld [vmem:[%s4613_s1 + $0x20] ss:$40 sps:$4 sm:$0xff] (!%p193_p9)   ;;  %v3650_v33 = vld [vmem:[%s4613_s1 + $0x70] ss:$40 sps:$4 sm:$0xff] (!%p193_p9)  }
  0x13   : > { %v3302_v29 = vld [vmem:[%s4613_s1 + $0x1c] ss:$40 sps:$4 sm:$0xff] (!%p193_p9)   ;;  %v3300_v34 = vld [vmem:[%s4613_s1 + $0x18] ss:$40 sps:$4 sm:$0xff] (!%p193_p9)   ;;  %v3308_v35 = vld [vmem:[%s4613_s1 + $0x6c] ss:$40 sps:$4 sm:$0xff] (!%p193_p9)  }
  0x14   : > { %441 = vmatpush1.bf16.msra.mxu0 (!%p193_p9), %v3568_v4  ;;  %3239 = vmatpush1.bf16.msra.mxu1 (!%p193_p9), %v3568_v4  ;;  %v3640_v32 = vld [vmem:[%s4613_s1 + $0x74] ss:$40 sps:$4 sm:$0xff] (!%p193_p9)   ;;  %v3306_v36 = vld [vmem:[%s4613_s1 + $0x68] ss:$40 sps:$4 sm:$0xff] (!%p193_p9)   ;;  %v261_v43 = vsub.s32 (!%p193_p9), 0, %v3748_v42  ;;  %v3754_v44 = vld [vmem:[%s4614_s2] sm:$0xff] (!%p193_p9) }
  0x15   : > { %s4627_s30 = smov (!%p222_p10, %s2972_s30), 3  ;;  %511 = vmatprep.subr.bf16.mxu1 %v3290_v5  ;;  %584 = vmatprep.subr.bf16.mxu0 %v3579_v6  ;;  %v265_v45 = vsub.s32 1, %v3748_v42  ;;  %v3463_v53 = vmov 1966171168   ;;  %v277_v58 = vsub.s32 4, %v3748_v42  ;;  %v281_v61 = vsub.s32 5, %v3748_v42 }
  0x16   : > { %s3125_s16 = sshll.u32 %s4627_s30, 5  ;;  %v3758_v46 = vrot.slane %v3754_v44, %v261_v43  ;;  %v1118_v54 = vunpack.c.l.s4 %v3463_v53  ;;  %v269_v62 = vsub.s32 2, %v3748_v42  ;;  %v289_v53 = vsub.s32 7, %v3748_v42  ;;  %s218_s8 = sand.u32 1, %s3452_s19  }
  0x17   : > { %s226_s6 = scalar_lea.vmem %s4612_s0, %s3125_s16  ;;  %v3761_v47 = vrot.slane %v3754_v44, %v265_v45  ;;  %vm4126_vm1 = vcmp.lt.s32.totalorder %v259_v41, 256  ;;  %vm2881_vm2 = vcmask 1041408   ;;  %s2971_s9 = sshll.u32 %s218_s8, 1 }
  0x18   : > { %v251_v7 = vld [vmem:[%s226_s6] sm:$0xff]  ;;  %v252_v8 = vld [vmem:[%s226_s6 + $0x8] sm:$0xff]  ;;  %v253_v9 = vld [vmem:[%s226_s6 + $0x10] sm:$0xff]  ;;  %s3122_s10 = sshll.u32 %s3517_s22, 5  ;;  %s220_s11 = scalar_lea.vmem [#allocation3], %s2971_s9 }
  0x19   : > { %v255_v10 = vpack.c.bf16 %v252_v8, %v251_v7  ;;  %v254_v11 = vld [vmem:[%s226_s6 + $0x18] sm:$0xff]  ;;  %v3015_v12 = vld [vmem:[%s226_s6 + $0x20] sm:$0xff]  ;;  %v3016_v13 = vld [vmem:[%s226_s6 + $0x28] sm:$0xff]  ;;  %s2908_s12 = sshll.u32 %s220_s11, 4  ;;  %s4570_s15 = scalar_lea.hbm %s4617_s5, %s3122_s10  ;;  %s4572_s12 = int_to_ptr.vmem [resolvable:$true] %s2908_s12 }
  0x1a   : > { %v1191_v14 = vpack.c.bf16 %v3016_v13, %v3015_v12  ;;  %v3017_v15 = vld [vmem:[%s226_s6 + $0x30] sm:$0xff]  ;;  %v3018_v16 = vld [vmem:[%s226_s6 + $0x38] sm:$0xff]  ;;  %v256_v17 = vpack.c.bf16 %v254_v11, %v253_v9  ;;  %v3778_v11 = vrot.slane %v3754_v44, %v269_v62  ;;  %s2895_s16 = scalar_lea.sflag [#allocation4], %s218_s8  ;;  %s3398_s17 = scalar_lea.vmem %s4572_s12, 32 }
  0x1b   : > { %309 = vxpose.xlu0.c.b16.start [1/2] (short) (narrow) %v255_v10, 64  ;;  %v1192_v18 = vpack.c.bf16 %v3018_v16, %v3017_v15  ;;  %v3775_v10 = vrot.slane %v3754_v44, %v281_v61  ;;  %p3399_p11 = scmp.ne.s32.totalorder %s4572_s12, %s3398_s17  ;;  %s3465_s22 = smov [#allocation3]  }
  0x1c   : > { %1193 = vxpose.xlu1.c.b16.start [1/2] (short) (narrow) %v1191_v14, 64  ;;  %s3402_s23 = sshll.u32 %s3465_s22, 4  ;;  %s3403_s23 = int_to_ptr.vmem [resolvable:$false] %s3402_s23 }
  0x1d   : > { %p3400_p12 = pnand %p3399_p11, %p3534_p5  ;;  %s3404_s25 = scalar_lea.vmem %s3403_s23, 64 }
  0x1e   : > { %p3405_p0 = scmp.lt.s32.totalorder %s4572_s12, %s3403_s23  ;;  %p3406_p1 = scmp.lt.s32.totalorder %s3404_s25, %s3398_s17 }
  0x1f   : > { %310 = vxpose.xlu0.c.b16.end [2/2] (short) (narrow) %v256_v17, 64  ;;  %p3401_p13 = pneg %p3400_p12 }
  0x20   : > { %1194 = vxpose.xlu1.c.b16.end [2/2] (short) (narrow) %v1192_v18, 64  ;;  %p3407_p2 = por %p3406_p1, %p3405_p0 }
  0x22   : > { %p3408_p3 = pnand %p3407_p2, %p3401_p13 }
  0x81   : > { %v317_v21 = vpop.trf.xlu0 }
  0x82   : > { %2995 = vmatmul.mubr.msk.bf16.vlgmr.msra.gmra.mrb[0].mxu0 %vm425_vm0, %v317_v21  ;;  %v1201_v37 = vpop.trf.xlu1 }
  0x83   : > { %480 = vmatprep.mubr.bf16.mxu0 %v3462_v2  ;;  %585 = vmatpush1.bf16.msra.mxu0 %v3590_v19 }
  0x84   : > { %586 = vmatprep.subr.bf16.mxu0 %v3595_v20 }
  0x85   : > { %v3611_v24 = vpop.trf.xlu0 }
  0x86   : > { %v1202_v38 = vpop.trf.xlu1 }
  0x87   : > { %587 = vmatpush1.bf16.msra.mxu0 %v3603_v22 }
  0x88   : > { %730 = vmatprep.subr.bf16.mxu0 %v3609_v23 }
  0x89   : > { %v319_v27 = vpop.trf.xlu0 }
  0x8a   : > { %2996 = vmatmul.mubr.msk.bf16.gmra.mrb[4].mxu0 %vm425_vm0, %v3611_v24  ;;  %2997 = vmatmul.mubr.msk.bf16.vlgmr.msra.gmra.mrb[0].mxu1 %vm425_vm0, %v319_v27  ;;  %v1203_v39 = vpop.trf.xlu1 }
  0x8b   : > { %512 = vmatpush1.bf16.msra.mxu1 %v3288_v25  ;;  %500 = vmatprep.mubr.bf16.mxu1 %v3462_v2 }
  0x8c   : > { %513 = vmatprep.subr.bf16.mxu1 %v3299_v26  ;;  %616 = vmatprep.mubr.bf16.mxu0 %v3462_v2 }
  0x8d   : > { %v320_v30 = vpop.trf.xlu0 }
  0x8e   : > { %v1204_v40 = vpop.trf.xlu1 }
  0x8f   : > { %514 = vmatpush1.bf16.msra.mxu1 %v3297_v28 }
  0x90   : > { %657 = vmatprep.subr.bf16.mxu1 %v3302_v29 }
  0x92   : > { %2998 = vmatmul.mubr.msk.bf16.gmra.mrb[4].mxu1 %vm425_vm0, %v320_v30  ;;  %3003 = vmatmul.mubr.msk.bf16.vlgmr.msra.gmra.mrb[8].mxu0 %vm425_vm0, %v317_v21 }
  0x93   : > { %543 = vmatprep.mubr.bf16.mxu1 %v3462_v2  ;;  %626 = vmatprep.mubr.bf16.mxu0 %v3462_v2 }
  0x94   : > { %731 = vmatpush1.bf16.msra.mxu0 %v3635_v31 }
  0x95   : > { %732 = vmatprep.subr.bf16.mxu0 %v3640_v32 }
  0x98   : > { %733 = vmatpush1.bf16.msra.mxu0 %v3650_v33 }
  0x99   : > { %1294 = vmatprep.subr.bf16.mxu0 %v3290_v5  ;;  %v3772_v5 = vrot.slane %v3754_v44, %v277_v58 }
  0x9a   : > { %2999 = vmatmul.mubr.msk.bf16.vlgmr.msra.gmra.mrb[8].mxu1 %vm425_vm0, %v317_v21  ;;  %3004 = vmatmul.mubr.msk.bf16.gmra.mrb[12].mxu0 %vm425_vm0, %v3611_v24 }
  0x9b   : > { %658 = vmatpush1.bf16.msra.mxu1 %v3300_v34  ;;  %553 = vmatprep.mubr.bf16.mxu1 %v3462_v2 }
  0x9c   : > { %636 = vmatprep.mubr.bf16.mxu0 %v3462_v2  ;;  %659 = vmatprep.subr.bf16.mxu1 %v3308_v35 }
  0x9f   : > { %660 = vmatpush1.bf16.msra.mxu1 %v3306_v36 }
  0xa0   : > { %1221 = vmatprep.subr.bf16.mxu1 %v3548_v0  ;;  %v273_v0 = vsub.s32 3, %v3748_v42 }
  0xa2   : > { %3000 = vmatmul.mubr.msk.bf16.gmra.mrb[12].mxu1 %vm425_vm0, %v3611_v24  ;;  %3005 = vmatmul.mubr.msk.bf16.gmra.mrb[16].mxu0 %vm425_vm0, %v319_v27  ;;  %v3783_v17 = vrot.slane %v3754_v44, %v273_v0 }
  0xa3   : > { %563 = vmatprep.mubr.bf16.mxu1 %v3462_v2  ;;  %646 = vmatprep.mubr.bf16.mxu0 %v3462_v2 }
  0xaa   : > { %3001 = vmatmul.mubr.msk.bf16.gmra.mrb[16].mxu1 %vm425_vm0, %v319_v27  ;;  %3006 = vmatmul.mubr.msk.bf16.gmra.mrb[20].mxu0 %vm425_vm0, %v320_v30 }
  0xab   : > { %573 = vmatprep.mubr.bf16.mxu1 %v3462_v2  ;;  %762 = vmatprep.mubr.bf16.mxu0 %v3462_v2 }
  0xb2   : > { %3002 = vmatmul.mubr.msk.bf16.gmra.mrb[20].mxu1 %vm425_vm0, %v320_v30  ;;  %3011 = vmatmul.mubr.msk.bf16.vlgmr.msra.gmra.mrb[24].mxu0 %vm425_vm0, %v317_v21 }
  0xb3   : > { %689 = vmatprep.mubr.bf16.mxu1 %v3462_v2  ;;  %772 = vmatprep.mubr.bf16.mxu0 %v3462_v2 }
  0xb4   : > { %1295 = vmatpush1.bf16.msra.mxu0 %v3288_v25 }
  0xb5   : > { %1296 = vmatprep.subr.bf16.mxu0 %v3299_v26 }
  0xb8   : > { %1297 = vmatpush1.bf16.msra.mxu0 %v3297_v28 }
  0xb9   : > { %1440 = vmatprep.subr.bf16.mxu0 %v3302_v29 }
  0xba   : > { %3007 = vmatmul.mubr.msk.bf16.vlgmr.msra.gmra.mrb[24].mxu1 %vm425_vm0, %v317_v21  ;;  %3012 = vmatmul.mubr.msk.bf16.gmra.mrb[28].mxu0 %vm425_vm0, %v3611_v24 }
  0xbb   : > { %1222 = vmatpush1.bf16.msra.mxu1 %v3553_v1  ;;  %699 = vmatprep.mubr.bf16.mxu1 %v3462_v2 }
  0xbc   : > { %782 = vmatprep.mubr.bf16.mxu0 %v3462_v2  ;;  %1223 = vmatprep.subr.bf16.mxu1 %v3561_v3 }
  0xbf   : > { %1224 = vmatpush1.bf16.msra.mxu1 %v3568_v4 }
  0xc0   : > { %1367 = vmatprep.subr.bf16.mxu1 %v3579_v6 }
  0xc2   : > { %3008 = vmatmul.mubr.msk.bf16.gmra.mrb[28].mxu1 %vm425_vm0, %v3611_v24  ;;  %3013 = vmatmul.mubr.msk.bf16.gmra.mrb[32].mxu0 %vm425_vm0, %v319_v27  ;;  %v250_v24 = vld [vmem:[%s4614_s2 + $0x8] sm:$0x3] }
  0xc3   : > { %709 = vmatprep.mubr.bf16.mxu1 %v3462_v2  ;;  %792 = vmatprep.mubr.bf16.mxu0 %v3462_v2 }
  0xca   : > { %3009 = vmatmul.mubr.msk.bf16.gmra.mrb[32].mxu1 %vm425_vm0, %v319_v27  ;;  %3014 = vmatmul.mubr.msk.bf16.gmra.mrb[36].mxu0 %vm425_vm0, %v320_v30 }
  0xcb   : > { %719 = vmatprep.mubr.bf16.mxu1 %v3462_v2  ;;  %1326 = vmatprep.mubr.bf16.mxu0 %v3462_v2 }
  0xd2   : > { %3010 = vmatmul.mubr.msk.bf16.gmra.mrb[36].mxu1 %vm425_vm0, %v320_v30  ;;  %3023 = vmatmul.mubr.msk.bf16.vlgmr.msra.gmra.mrb[40].mxu0 %vm425_vm0, %v1201_v37 }
  0xd3   : > { %1253 = vmatprep.mubr.bf16.mxu1 %v3462_v2  ;;  %1336 = vmatprep.mubr.bf16.mxu0 %v3462_v2 }
  0xd4   : > { %1441 = vmatpush1.bf16.msra.mxu0 %v3300_v34 }
  0xd5   : > { %1442 = vmatprep.subr.bf16.mxu0 %v3308_v35 }
  0xd8   : > { %1443 = vmatpush1.bf16.msra.mxu0 %v3306_v36 }
  0xda   : > { %3019 = vmatmul.mubr.msk.bf16.vlgmr.msra.gmra.mrb[40].mxu1 %vm425_vm0, %v1201_v37  ;;  %3024 = vmatmul.mubr.msk.bf16.gmra.mrb[44].mxu0 %vm425_vm0, %v1202_v38 }
  0xdb   : > { %1368 = vmatpush1.bf16.msra.mxu1 %v3590_v19  ;;  %1263 = vmatprep.mubr.bf16.mxu1 %v3462_v2 }
  0xdc   : > { %1346 = vmatprep.mubr.bf16.mxu0 %v3462_v2  ;;  %1369 = vmatprep.subr.bf16.mxu1 %v3595_v20 }
  0xdf   : > { %1370 = vmatpush1.bf16.msra.mxu1 %v3603_v22 }
  0xe0   : > { %1513 = vmatprep.subr.bf16.mxu1 %v3609_v23 }
  0xe2   : > { %3020 = vmatmul.mubr.msk.bf16.gmra.mrb[44].mxu1 %vm425_vm0, %v1202_v38  ;;  %3025 = vmatmul.mubr.msk.bf16.gmra.mrb[48].mxu0 %vm425_vm0, %v1203_v39 }
  0xe3   : > { %1273 = vmatprep.mubr.bf16.mxu1 %v3462_v2  ;;  %1356 = vmatprep.mubr.bf16.mxu0 %v3462_v2 }
  0xea   : > { %3021 = vmatmul.mubr.msk.bf16.gmra.mrb[48].mxu1 %vm425_vm0, %v1203_v39  ;;  %3026 = vmatmul.mubr.msk.bf16.gmra.mrb[52].mxu0 %vm425_vm0, %v1204_v40 }
  0xeb   : > { %1283 = vmatprep.mubr.bf16.mxu1 %v3462_v2  ;;  %1472 = vmatprep.mubr.bf16.mxu0 %v3462_v2 }
  0xf2   : > { %3022 = vmatmul.mubr.msk.bf16.gmra.mrb[52].mxu1 %vm425_vm0, %v1204_v40  ;;  %3031 = vmatmul.mubr.msk.bf16.vlgmr.msra.gmra.mrb[56].mxu0 %vm425_vm0, %v1201_v37 }
  0xf3   : > { %1399 = vmatprep.mubr.bf16.mxu1 %v3462_v2  ;;  %1482 = vmatprep.mubr.bf16.mxu0 %v3462_v2 }
  0xfa   : > { %3027 = vmatmul.mubr.msk.bf16.vlgmr.msra.gmra.mrb[56].mxu1 %vm425_vm0, %v1201_v37  ;;  %3032 = vmatmul.mubr.msk.bf16.gmra.mrb[60].mxu0 %vm425_vm0, %v1202_v38 }
  0xfb   : > { %1409 = vmatprep.mubr.bf16.mxu1 %v3462_v2  ;;  %1492 = vmatprep.mubr.bf16.mxu0 %v3462_v2 }
  0xfc   : > { %1514 = vmatpush1.bf16.msra.mxu1 %v3635_v31 }
  0xfd   : > { %1515 = vmatprep.subr.bf16.mxu1 %v3640_v32 }
 0x100   : > { %1516 = vmatpush1.bf16.msra.mxu1 %v3650_v33 }
 0x102   : > { %3028 = vmatmul.mubr.msk.bf16.gmra.mrb[60].mxu1 %vm425_vm0, %v1202_v38  ;;  %3033 = vmatmul.mubr.msk.bf16.gmra.mrb[64].mxu0 %vm425_vm0, %v1203_v39 }
 0x103   : > { %1419 = vmatprep.mubr.bf16.mxu1 %v3462_v2  ;;  %1502 = vmatprep.mubr.bf16.mxu0 %v3462_v2 }
 0x10a   : > { %3029 = vmatmul.mubr.msk.bf16.gmra.mrb[64].mxu1 %vm425_vm0, %v1203_v39  ;;  %3034 = vmatmul.mubr.msk.bf16.gmra.mrb[68].mxu0 %vm425_vm0, %v1204_v40 }
 0x10b   : > { %1429 = vmatprep.mubr.bf16.mxu1 %v3462_v2 }
 0x112   : > { %3030 = vmatmul.mubr.msk.bf16.gmra.mrb[68].mxu1 %vm425_vm0, %v1204_v40 }
 0x113   : > { %1545 = vmatprep.mubr.bf16.mxu1 %v3462_v2 }
 0x11a   : > { %3035 = vmatmul.mubr.msk.bf16.vlgmr.msra.gmra.mrb[72].mxu1 %vm425_vm0, %v1201_v37 }
 0x11b   : > { %1555 = vmatprep.mubr.bf16.mxu1 %v3462_v2 }
 0x122   : > { %3036 = vmatmul.mubr.msk.bf16.gmra.mrb[76].mxu1 %vm425_vm0, %v1202_v38  ;;  %v3797_v38 = vrot.slane %v250_v24, %v261_v43 }
 0x123   : > { %1565 = vmatprep.mubr.bf16.mxu1 %v3462_v2 }
 0x12a   : > { %3037 = vmatmul.mubr.msk.bf16.gmra.mrb[80].mxu1 %vm425_vm0, %v1203_v39 }
 0x12b   : > { %1575 = vmatprep.mubr.bf16.mxu1 %v3462_v2  ;;  %v1119_v2 = vunpack.c.0.s8 %v1118_v54 }
 0x12d   : > { %v3788_v23 = vsub.s32 %v1119_v2, %v3748_v42 }
 0x132   : > { %3038 = vmatmul.mubr.msk.bf16.gmra.mrb[84].mxu1 %vm425_vm0, %v1204_v40 }
 0x155   : > { %v472_v48 = vpop.f32.mrb[0].mxu0 }
 0x156   : > { %v473_v49 = vadd.f32 %v472_v48, %v3758_v46  ;;  %v474_v50 = vpop.f32.mrb[1].mxu0 }
 0x157   : > { %v475_v51 = vadd.f32 %v474_v50, %v3761_v47  ;;  %v476_v52 = vpop.f32.mrb[2].mxu0 }
 0x158   : > { %v803_v55 = vmax.f32 %v473_v49, 0.0  ;;  %v477_v56 = vadd.f32 %v476_v52, %v3758_v46  ;;  %v478_v57 = vpop.f32.mrb[3].mxu0  ;;  %v3799_v49 = vrot.slane %v250_v24, %v265_v45  ;;  %v285_v52 = vsub.s32 6, %v3748_v42 }
 0x159   : > { %v804_v59 = vmax.f32 %v475_v51, 0.0  ;;  %v479_v60 = vadd.f32 %v478_v57, %v3761_v47 }
 0x15a   : > { %v813_v63 = vmax.f32 %v477_v56, 0.0  ;;  %v883_v3 = vmin.f32 %v803_v55, 6.0  ;;  %v3810_v24 = vrot.slane %v3754_v44, %v285_v52 }
 0x15b   : > { %v814_v1 = vmax.f32 %v479_v60, 0.0  ;;  %v884_v6 = vmin.f32 %v804_v59, 6.0 }
 0x15c   : > { %v893_v4 = vmin.f32 %v813_v63, 6.0 }
 0x15d   : > { %v894_v7 = vmin.f32 %v814_v1, 6.0  ;;  %v482_v8 = vpop.f32.mrb[4].mxu0  ;;  %v492_v9 = vpop.f32.mrb[0].mxu1 }
 0x15e   : > { %v963_v12 = vadd.f32 %v893_v4, %v883_v3  ;;  %v483_v13 = vadd.f32 %v482_v8, %v3758_v46  ;;  %v493_v14 = vadd.f32 %v492_v9, %v3758_v46  ;;  %v484_v15 = vpop.f32.mrb[5].mxu0  ;;  %v494_v16 = vpop.f32.mrb[1].mxu1 }
 0x15f   : > { %v976_v18 = vadd.f32 %v894_v7, %v884_v6  ;;  %v485_v19 = vadd.f32 %v484_v15, %v3761_v47  ;;  %v495_v20 = vadd.f32 %v494_v16, %v3761_v47  ;;  %v486_v21 = vpop.f32.mrb[6].mxu0  ;;  %v496_v22 = vpop.f32.mrb[2].mxu1 }
 0x160   : > { %v823_v25 = vmax.f32 %v483_v13, 0.0  ;;  %v843_v26 = vmax.f32 %v493_v14, 0.0  ;;  %v487_v27 = vadd.f32 %v486_v21, %v3758_v46  ;;  %v497_v28 = vadd.f32 %v496_v22, %v3758_v46  ;;  %v488_v29 = vpop.f32.mrb[7].mxu0  ;;  %v498_v30 = vpop.f32.mrb[3].mxu1 }
 0x161   : > { %v824_v31 = vmax.f32 %v485_v19, 0.0  ;;  %v844_v32 = vmax.f32 %v495_v20, 0.0  ;;  %v489_v33 = vadd.f32 %v488_v29, %v3761_v47  ;;  %v499_v34 = vadd.f32 %v498_v30, %v3761_v47 }
 0x162   : > { %v903_v35 = vmin.f32 %v823_v25, 6.0  ;;  %v833_v36 = vmax.f32 %v487_v27, 0.0  ;;  %v853_v37 = vmax.f32 %v497_v28, 0.0  ;;  %v923_v54 = vmin.f32 %v843_v26, 6.0 }
 0x163   : > { %v904_v39 = vmin.f32 %v824_v31, 6.0  ;;  %v834_v40 = vmax.f32 %v489_v33, 0.0  ;;  %v854_v48 = vmax.f32 %v499_v34, 0.0  ;;  %v924_v56 = vmin.f32 %v844_v32, 6.0 }
 0x164   : > { %v964_v50 = vadd.f32 %v963_v12, %v903_v35  ;;  %v913_v51 = vmin.f32 %v833_v36, 6.0  ;;  %v933_v43 = vmin.f32 %v853_v37, 6.0  ;;  %v3813_v28 = vrot.slane %v3754_v44, %v289_v53 }
 0x165   : > { %v977_v55 = vadd.f32 %v976_v18, %v904_v39  ;;  %v914_v57 = vmin.f32 %v834_v40, 6.0  ;;  %v502_v58 = vpop.f32.mrb[4].mxu1  ;;  %v618_v59 = vpop.f32.mrb[8].mxu0  ;;  %v934_v1 = vmin.f32 %v854_v48, 6.0 }
 0x166   : > { %v965_v60 = vadd.f32 %v964_v50, %v913_v51  ;;  %v503_v61 = vadd.f32 %v502_v58, %v3758_v46  ;;  %v619_v62 = vadd.f32 %v618_v59, %v3772_v5  ;;  %v504_v45 = vpop.f32.mrb[5].mxu1  ;;  %v620_v63 = vpop.f32.mrb[9].mxu0 }
 0x167   : > { %v978_v0 = vadd.f32 %v977_v55, %v914_v57  ;;  %v505_v2 = vadd.f32 %v504_v45, %v3761_v47  ;;  %v621_v3 = vadd.f32 %v620_v63, %v3775_v10  ;;  %v506_v4 = vpop.f32.mrb[6].mxu1  ;;  %v622_v6 = vpop.f32.mrb[10].mxu0 }
 0x168   : > { %v966_v7 = vadd.f32 %v965_v60, %v923_v54  ;;  %v863_v8 = vmax.f32 %v503_v61, 0.0  ;;  %v807_v9 = vmax.f32 %v619_v62, 0.0  ;;  %v507_v12 = vadd.f32 %v506_v4, %v3758_v46  ;;  %v508_v13 = vpop.f32.mrb[7].mxu1  ;;  %v624_v14 = vpop.f32.mrb[11].mxu0 }
 0x169   : > { %v979_v15 = vadd.f32 %v978_v0, %v924_v56  ;;  %v864_v16 = vmax.f32 %v505_v2, 0.0  ;;  %v808_v18 = vmax.f32 %v621_v3, 0.0  ;;  %v623_v19 = vadd.f32 %v622_v6, %v3772_v5 }
 0x16a   : > { %v967_v20 = vadd.f32 %v966_v7, %v933_v43  ;;  %v943_v21 = vmin.f32 %v863_v8, 6.0  ;;  %v873_v22 = vmax.f32 %v507_v12, 0.0  ;;  %v509_v31 = vadd.f32 %v508_v13, %v3761_v47 }
 0x16b   : > { %v980_v25 = vadd.f32 %v979_v15, %v934_v1  ;;  %v944_v26 = vmin.f32 %v864_v16, 6.0  ;;  %v817_v27 = vmax.f32 %v623_v19, 0.0  ;;  %v625_v32 = vadd.f32 %v624_v14, %v3775_v10 }
 0x16c   : > { %v968_v29 = vadd.f32 %v967_v20, %v943_v21  ;;  %v953_v30 = vmin.f32 %v873_v22, 6.0  ;;  %v887_v33 = vmin.f32 %v807_v9, 6.0  ;;  %v888_v35 = vmin.f32 %v808_v18, 6.0 }
 0x16d   : > { %v981_v34 = vadd.f32 %v980_v25, %v944_v26  ;;  %v897_v36 = vmin.f32 %v817_v27, 6.0  ;;  %v545_v37 = vpop.f32.mrb[8].mxu1  ;;  %v628_v39 = vpop.f32.mrb[12].mxu0  ;;  %v874_v48 = vmax.f32 %v509_v31, 0.0  ;;  %v818_v50 = vmax.f32 %v625_v32, 0.0 }
 0x16e   : > { %v969_v40 = vadd.f32 %v968_v29, %v953_v30  ;;  %v546_v51 = vadd.f32 %v545_v37, %v3778_v11  ;;  %v547_v52 = vpop.f32.mrb[9].mxu1  ;;  %v630_v44 = vpop.f32.mrb[13].mxu0  ;;  %v629_v54 = vadd.f32 %v628_v39, %v3772_v5 }
 0x16f   : > { %v1015_v53 = vadd.f32 %v897_v36, %v887_v33  ;;  %v548_v55 = vadd.f32 %v547_v52, %v3783_v17  ;;  %v631_v56 = vadd.f32 %v630_v44, %v3775_v10  ;;  %v549_v57 = vpop.f32.mrb[10].mxu1  ;;  %v632_v58 = vpop.f32.mrb[14].mxu0  ;;  %v954_v60 = vmin.f32 %v874_v48, 6.0 }
 0x170   : > { %v970_v59 = vrot.slane %v969_v40, 4  ;;  %v898_v43 = vmin.f32 %v818_v50, 6.0  ;;  %v805_v61 = vmax.f32 %v546_v51, 0.0  ;;  %v551_v62 = vpop.f32.mrb[11].mxu1  ;;  %v634_v45 = vpop.f32.mrb[15].mxu0  ;;  %v827_v63 = vmax.f32 %v629_v54, 0.0 }
 0x171   : > { %v806_v0 = vmax.f32 %v548_v55, 0.0  ;;  %v828_v1 = vmax.f32 %v631_v56, 0.0  ;;  %v550_v2 = vadd.f32 %v549_v57, %v3778_v11  ;;  %v982_v4 = vadd.f32 %v981_v34, %v954_v60 }
 0x172   : > { %v971_v3 = vadd.f32 %v970_v59, %v969_v40  ;;  %v1028_v6 = vadd.f32 %v898_v43, %v888_v35  ;;  %v885_v7 = vmin.f32 %v805_v61, 6.0  ;;  %v907_v8 = vmin.f32 %v827_v63, 6.0 }
 0x173   : > { %v886_v9 = vmin.f32 %v806_v0, 6.0  ;;  %v908_v12 = vmin.f32 %v828_v1, 6.0  ;;  %v815_v13 = vmax.f32 %v550_v2, 0.0  ;;  %v983_v15 = vrot.slane %v982_v4, 4 }
 0x174   : > { %v972_v14 = vrot.slane %v971_v3, 2  ;;  %v633_v16 = vadd.f32 %v632_v58, %v3772_v5  ;;  %v552_v18 = vadd.f32 %v551_v62, %v3783_v17  ;;  %v1016_v19 = vadd.f32 %v1015_v53, %v907_v8 }
 0x175   : > { %v1029_v20 = vadd.f32 %v1028_v6, %v908_v12  ;;  %v895_v21 = vmin.f32 %v815_v13, 6.0  ;;  %v635_v22 = vadd.f32 %v634_v45, %v3775_v10  ;;  %v555_v25 = vpop.f32.mrb[12].mxu1  ;;  %v638_v26 = vpop.f32.mrb[16].mxu0  ;;  %v984_v29 = vadd.f32 %v983_v15, %v982_v4 }
 0x176   : > { %v973_v27 = vadd.f32 %v972_v14, %v971_v3  ;;  %v837_v30 = vmax.f32 %v633_v16, 0.0  ;;  %v816_v31 = vmax.f32 %v552_v18, 0.0  ;;  %v557_v32 = vpop.f32.mrb[13].mxu1  ;;  %v640_v33 = vpop.f32.mrb[17].mxu0  ;;  %v556_v36 = vadd.f32 %v555_v25, %v3778_v11 }
 0x177   : > { %v989_v34 = vadd.f32 %v895_v21, %v885_v7  ;;  %v838_v35 = vmax.f32 %v635_v22, 0.0  ;;  %v639_v37 = vadd.f32 %v638_v26, %v3772_v5  ;;  %v559_v39 = vpop.f32.mrb[14].mxu1  ;;  %v642_v40 = vpop.f32.mrb[18].mxu0  ;;  %v985_v50 = vrot.slane %v984_v29, 2 }
 0x178   : > { %v974_v48 = vrot.slane %v973_v27, 1  ;;  %v917_v51 = vmin.f32 %v837_v30, 6.0  ;;  %v896_v52 = vmin.f32 %v816_v31, 6.0  ;;  %v561_v44 = vpop.f32.mrb[15].mxu1  ;;  %v644_v53 = vpop.f32.mrb[19].mxu0  ;;  %v825_v55 = vmax.f32 %v556_v36, 0.0 }
 0x179   : > { %v918_v54 = vmin.f32 %v838_v35, 6.0  ;;  %v847_v56 = vmax.f32 %v639_v37, 0.0  ;;  %v558_v57 = vadd.f32 %v557_v32, %v3783_v17  ;;  %v986_v59 = vadd.f32 %v985_v50, %v984_v29 }
 0x17a   : > { %v975_v58 = vadd.f32 %v974_v48, %v973_v27  ;;  %v1017_v60 = vadd.f32 %v1016_v19, %v917_v51  ;;  %v1002_v43 = vadd.f32 %v896_v52, %v886_v9  ;;  %v905_v62 = vmin.f32 %v825_v55, 6.0 }
 0x17b   : > { %v1030_v61 = vadd.f32 %v1029_v20, %v918_v54  ;;  %v927_v45 = vmin.f32 %v847_v56, 6.0  ;;  %v826_v63 = vmax.f32 %v558_v57, 0.0  ;;  %v987_v1 = vrot.slane %v986_v59, 1 }
 0x17c   : > { %v1093_v0 = vmul.f32 0.015625, %v975_v58  ;;  %v641_v2 = vadd.f32 %v640_v33, %v3775_v10  ;;  %v560_v3 = vadd.f32 %v559_v39, %v3778_v11  ;;  %v990_v4 = vadd.f32 %v989_v34, %v905_v62 }
 0x17d   : > { %v1018_v6 = vadd.f32 %v1017_v60, %v927_v45  ;;  %v906_v7 = vmin.f32 %v826_v63, 6.0  ;;  %v643_v8 = vadd.f32 %v642_v40, %v3772_v5  ;;  %v565_v12 = vpop.f32.mrb[16].mxu1  ;;  %v648_v13 = vpop.f32.mrb[20].mxu0  ;;  %v988_v14 = vadd.f32 %v987_v1, %v986_v59 }
 0x17e   : > { %v848_v15 = vmax.f32 %v641_v2, 0.0  ;;  %v835_v9 = vmax.f32 %v560_v3, 0.0  ;;  %v562_v16 = vadd.f32 %v561_v44, %v3783_v17  ;;  %v567_v18 = vpop.f32.mrb[17].mxu1  ;;  %v650_v19 = vpop.f32.mrb[21].mxu0  ;;  %v645_v22 = vadd.f32 %v644_v53, %v3775_v10 }
 0x17f   : > { %v1003_v20 = vadd.f32 %v1002_v43, %v906_v7  ;;  %v857_v21 = vmax.f32 %v643_v8, 0.0  ;;  %v566_v25 = vadd.f32 %v565_v12, %v3778_v11  ;;  %v569_v26 = vpop.f32.mrb[18].mxu1  ;;  %v652_v27 = vpop.f32.mrb[22].mxu0  ;;  %v1094_v29 = vmul.f32 0.015625, %v988_v14 }
 0x180   : > { %v928_v30 = vmin.f32 %v848_v15, 6.0  ;;  %v915_v31 = vmin.f32 %v835_v9, 6.0  ;;  %v836_v32 = vmax.f32 %v562_v16, 0.0  ;;  %v571_v33 = vpop.f32.mrb[19].mxu1  ;;  %v654_v34 = vpop.f32.mrb[23].mxu0  ;;  %v858_v36 = vmax.f32 %v645_v22, 0.0 }
 0x181   : > { %v937_v35 = vmin.f32 %v857_v21, 6.0  ;;  %v845_v37 = vmax.f32 %v566_v25, 0.0  ;;  %v649_v39 = vadd.f32 %v648_v13, %v3772_v5  ;;  %v1113_v40 = vcombine.low %v1093_v0, %v1094_v29 }
 0x182   : > { %v1031_v48 = vadd.f32 %v1030_v61, %v928_v30  ;;  %v991_v50 = vadd.f32 %v990_v4, %v915_v31  ;;  %v916_v51 = vmin.f32 %v836_v32, 6.0  ;;  %v938_v44 = vmin.f32 %v858_v36, 6.0 }
 0x183   : > { %v1019_v52 = vadd.f32 %v1018_v6, %v937_v35  ;;  %v925_v53 = vmin.f32 %v845_v37, 6.0  ;;  %v867_v54 = vmax.f32 %v649_v39, 0.0  ;;  %v3836_v55 = vrot.slane %v1113_v40, %v3788_v23 }
 0x184   : > { %v1004_v56 = vadd.f32 %v1003_v20, %v916_v51  ;;  %v568_v57 = vadd.f32 %v567_v18, %v3783_v17  ;;  %v651_v58 = vadd.f32 %v650_v19, %v3775_v10  ;;  %v1032_v59 = vadd.f32 %v1031_v48, %v938_v44 }
 0x185   : > { %v992_v60 = vadd.f32 %v991_v50, %v925_v53  ;;  %v947_v43 = vmin.f32 %v867_v54, 6.0  ;;  %v570_v62 = vadd.f32 %v569_v26, %v3778_v11  ;;  %v575_v61 = vpop.f32.mrb[20].mxu1  ;;  %v764_v45 = vpop.f32.mrb[24].mxu0  ;;  %v653_v1 = vadd.f32 %v652_v27, %v3772_v5 }
 0x186   : > { %v846_v63 = vmax.f32 %v568_v57, 0.0  ;;  %v868_v0 = vmax.f32 %v651_v58, 0.0  ;;  %v572_v2 = vadd.f32 %v571_v33, %v3783_v17  ;;  %v577_v3 = vpop.f32.mrb[21].mxu1  ;;  %v766_v4 = vpop.f32.mrb[25].mxu0  ;;  %v655_v8 = vadd.f32 %v654_v34, %v3775_v10 }
 0x187   : > { %v1020_v6 = vadd.f32 %v1019_v52, %v947_v43  ;;  %v855_v7 = vmax.f32 %v570_v62, 0.0  ;;  %v576_v12 = vadd.f32 %v575_v61, %v3778_v11  ;;  %v579_v13 = vpop.f32.mrb[22].mxu1  ;;  %v768_v14 = vpop.f32.mrb[26].mxu0  ;;  %v877_v16 = vmax.f32 %v653_v1, 0.0 }
 0x188   : > { %v926_v15 = vmin.f32 %v846_v63, 6.0  ;;  %v948_v9 = vmin.f32 %v868_v0, 6.0  ;;  %v856_v18 = vmax.f32 %v572_v2, 0.0  ;;  %v581_v19 = vpop.f32.mrb[23].mxu1  ;;  %v770_v20 = vpop.f32.mrb[27].mxu0  ;;  %v878_v22 = vmax.f32 %v655_v8, 0.0 }
 0x189   : > { %v935_v21 = vmin.f32 %v855_v7, 6.0  ;;  %v865_v25 = vmax.f32 %v576_v12, 0.0  ;;  %v765_v26 = vadd.f32 %v764_v45, %v3797_v38  ;;  %v957_v30 = vmin.f32 %v877_v16, 6.0 }
 0x18a   : > { %v1005_v27 = vadd.f32 %v1004_v56, %v926_v15  ;;  %v1033_v29 = vadd.f32 %v1032_v59, %v948_v9  ;;  %v936_v31 = vmin.f32 %v856_v18, 6.0  ;;  %v958_v33 = vmin.f32 %v878_v22, 6.0 }
 0x18b   : > { %v993_v32 = vadd.f32 %v992_v60, %v935_v21  ;;  %v945_v34 = vmin.f32 %v865_v25, 6.0  ;;  %v811_v35 = vmax.f32 %v765_v26, 0.0  ;;  %v1021_v36 = vadd.f32 %v1020_v6, %v957_v30  ;;  %v3312_v25 = vld [vmem:[%s4615_s3 + $0x40] sm:$0xff]  }
 0x18c   : > { %v1006_v37 = vadd.f32 %v1005_v27, %v936_v31  ;;  %v578_v39 = vadd.f32 %v577_v3, %v3783_v17  ;;  %v767_v40 = vadd.f32 %v766_v4, %v3799_v49  ;;  %v1034_v48 = vadd.f32 %v1033_v29, %v958_v33  ;;  %v3313_v31 = vld [vmem:[%s4615_s3] sm:$0xff]   ;;  %3126 = vmatprep.subr.bf16.mxu0 %v3312_v25 }
 0x18d   : > { %v994_v50 = vadd.f32 %v993_v32, %v945_v34  ;;  %v891_v51 = vmin.f32 %v811_v35, 6.0  ;;  %v580_v52 = vadd.f32 %v579_v13, %v3778_v11  ;;  %v691_v44 = vpop.f32.mrb[24].mxu1  ;;  %v774_v53 = vpop.f32.mrb[28].mxu0  ;;  %v1022_v54 = vrot.slane %v1021_v36, 4  ;;  %3127 = vmatpush3.bf16.msra.mxu0 %v3313_v31 }
 0x18e   : > { %v866_v56 = vmax.f32 %v578_v39, 0.0  ;;  %v812_v57 = vmax.f32 %v767_v40, 0.0  ;;  %v769_v58 = vadd.f32 %v768_v14, %v3797_v38  ;;  %v693_v59 = vpop.f32.mrb[25].mxu1  ;;  %v776_v60 = vpop.f32.mrb[29].mxu0  ;;  %v1035_v43 = vrot.slane %v1034_v48, 4  ;;  %v3314_v39 = vld [vmem:[%s4615_s3 + $0xc0] sm:$0xff]  }
 0x18f   : > { %v875_v62 = vmax.f32 %v580_v52, 0.0  ;;  %v582_v61 = vadd.f32 %v581_v19, %v3783_v17  ;;  %v771_v45 = vadd.f32 %v770_v20, %v3799_v49  ;;  %v695_v63 = vpop.f32.mrb[26].mxu1  ;;  %v3852_v0 = vpop.f32.mrb[30].mxu0  ;;  %v1023_v1 = vadd.f32 %v1022_v54, %v1021_v36  ;;  %3148 = vmatprep.subr.bf16.mxu1 %v3314_v39 }
 0x190   : > { %v946_v2 = vmin.f32 %v866_v56, 6.0  ;;  %v892_v3 = vmin.f32 %v812_v57, 6.0  ;;  %v821_v4 = vmax.f32 %v769_v58, 0.0  ;;  %v3854_v6 = vpop.f32.mrb[27].mxu1  ;;  %v3856_v7 = vpop.f32.mrb[31].mxu0  ;;  %v1036_v8 = vadd.f32 %v1035_v43, %v1034_v48 }
 0x191   : > { %v955_v12 = vmin.f32 %v875_v62, 6.0  ;;  %v876_v13 = vmax.f32 %v582_v61, 0.0  ;;  %v822_v14 = vmax.f32 %v771_v45, 0.0  ;;  %v1024_v15 = vrot.slane %v1023_v1, 2 }
 0x192   : > { %v1007_v9 = vadd.f32 %v1006_v37, %v946_v2  ;;  %v901_v16 = vmin.f32 %v821_v4, 6.0  ;;  %v692_v18 = vadd.f32 %v691_v44, %v3810_v24  ;;  %v1037_v19 = vrot.slane %v1036_v8, 2 }
 0x193   : > { %v995_v20 = vadd.f32 %v994_v50, %v955_v12  ;;  %v956_v21 = vmin.f32 %v876_v13, 6.0  ;;  %v902_v22 = vmin.f32 %v822_v14, 6.0  ;;  %v1025_v26 = vadd.f32 %v1024_v15, %v1023_v1  ;;  %v3318_v15 = vld [vmem:[%s4615_s3 + $0xc8] sm:$0xff]  }
 0x194   : > { %v1067_v27 = vadd.f32 %v901_v16, %v891_v51  ;;  %v809_v29 = vmax.f32 %v692_v18, 0.0  ;;  %v775_v30 = vadd.f32 %v774_v53, %v3797_v38  ;;  %v1038_v32 = vadd.f32 %v1037_v19, %v1036_v8  ;;  %v3315_v53 = vld [vmem:[%s4615_s3 + $0x80] sm:$0xff]   ;;  %v3319_v19 = vld [vmem:[%s4615_s3 + $0x88] sm:$0xff]  }
 0x195   : > { %v996_v33 = vrot.slane %v995_v20, 4  ;;  %v1008_v34 = vadd.f32 %v1007_v9, %v956_v21  ;;  %v1080_v35 = vadd.f32 %v902_v22, %v892_v3  ;;  %v3866_v36 = vpop.f32.mrb[28].mxu1  ;;  %v3868_v37 = vpop.f32.mrb[32].mxu0  ;;  %v1026_v40 = vrot.slane %v1025_v26, 1  ;;  %3149 = vmatpush3.bf16.msra.mxu1 %v3315_v53 }
 0x196   : > { %v889_v48 = vmin.f32 %v809_v29, 6.0  ;;  %v831_v50 = vmax.f32 %v775_v30, 0.0  ;;  %v694_v51 = vadd.f32 %v693_v59, %v3813_v28  ;;  %v3874_v52 = vpop.f32.mrb[29].mxu1  ;;  %v3876_v44 = vpop.f32.mrb[33].mxu0  ;;  %v1039_v54 = vrot.slane %v1038_v32, 1  ;;  %v3316_v59 = vld [vmem:[%s4615_s3 + $0x48] sm:$0xff]   ;;  %3150 = vmatprep.subr.bf16.mxu1 %v3318_v15 }
 0x197   : > { %v997_v56 = vadd.f32 %v996_v33, %v995_v20  ;;  %v1009_v57 = vrot.slane %v1008_v34, 4  ;;  %v777_v58 = vadd.f32 %v776_v60, %v3799_v49  ;;  %v3882_v43 = vpop.f32.mrb[30].mxu1  ;;  %v3884_v62 = vpop.f32.mrb[34].mxu0  ;;  %v1027_v61 = vadd.f32 %v1026_v40, %v1025_v26  ;;  %v3317_v60 = vld [vmem:[%s4615_s3 + $0x8] sm:$0xff]   ;;  %3128 = vmatprep.subr.bf16.mxu0 %v3316_v59  ;;  %v3320_v26 = vld [vmem:[%s4615_s3 + $0x50] sm:$0xff]  }
 0x198   : > { %v911_v45 = vmin.f32 %v831_v50, 6.0  ;;  %v810_v1 = vmax.f32 %v694_v51, 0.0  ;;  %v696_v2 = vadd.f32 %v695_v63, %v3810_v24  ;;  %v3890_v3 = vpop.f32.mrb[31].mxu1  ;;  %v3892_v4 = vpop.f32.mrb[35].mxu0  ;;  %v1040_v8 = vadd.f32 %v1039_v54, %v1038_v32  ;;  %3129 = vmatpush3.bf16.msra.mxu0 %v3317_v60  ;;  %v3321_v32 = vld [vmem:[%s4615_s3 + $0x10] sm:$0xff]  }
 0x199   : > { %v998_v12 = vrot.slane %v997_v56, 2  ;;  %v1010_v13 = vadd.f32 %v1009_v57, %v1008_v34  ;;  %v832_v14 = vmax.f32 %v777_v58, 0.0  ;;  %v1097_v9 = vmul.f32 0.015625, %v1027_v61  ;;  %3151 = vmatpush3.bf16.msra.mxu1 %v3319_v19  ;;  %3130 = vmatprep.subr.bf16.mxu0 %v3320_v26 }
 0x19a   : > { %v1068_v63 = vadd.f32 %v1067_v27, %v911_v45  ;;  %v890_v16 = vmin.f32 %v810_v1, 6.0  ;;  %v819_v18 = vmax.f32 %v696_v2, 0.0  ;;  %v1098_v20 = vmul.f32 0.015625, %v1040_v8  ;;  %v3324_v2 = vld [vmem:[%s4615_s3 + $0x58] sm:$0xff]  }
 0x19b   : > { %v999_v21 = vadd.f32 %v998_v12, %v997_v56  ;;  %v1011_v22 = vrot.slane %v1010_v13, 2  ;;  %v912_v25 = vmin.f32 %v832_v14, 6.0  ;;  %v779_v27 = vadd.f32 %v3852_v0, %v3797_v38  ;;  %v3322_v0 = vld [vmem:[%s4615_s3 + $0xd0] sm:$0xff]  }
 0x19c   : > { %v899_v29 = vmin.f32 %v819_v18, 6.0  ;;  %v698_v30 = vadd.f32 %v3854_v6, %v3813_v28  ;;  %v781_v31 = vadd.f32 %v3856_v7, %v3799_v49  ;;  %v1115_v33 = vcombine.low %v1097_v9, %v1098_v20  ;;  %3131 = vmatpush3.bf16.msra.mxu0 %v3321_v32  ;;  %3152 = vmatprep.subr.bf16.mxu1 %v3322_v0  ;;  %v3328_v32 = vld [vmem:[%s4615_s3 + $0x60] sm:$0xff]  }
 0x19d   : > { %v1000_v34 = vrot.slane %v999_v21, 1  ;;  %v1012_v39 = vadd.f32 %v1011_v22, %v1010_v13  ;;  %v1081_v40 = vadd.f32 %v1080_v35, %v912_v25  ;;  %v3915_v50 = vpop.f32.mrb[32].mxu1  ;;  %v3917_v51 = vpop.f32.mrb[36].mxu0  ;;  %v841_v7 = vmax.f32 %v779_v27, 0.0  ;;  %v3323_v35 = vld [vmem:[%s4615_s3 + $0x90] sm:$0xff]   ;;  %3132 = vmatprep.subr.bf16.mxu0 %v3324_v2 }
 0x19e   : > { %v1041_v6 = vadd.f32 %v899_v29, %v889_v48  ;;  %v820_v53 = vmax.f32 %v698_v30, 0.0  ;;  %v842_v54 = vmax.f32 %v781_v31, 0.0  ;;  %v3922_v56 = vpop.f32.mrb[33].mxu1  ;;  %v3924_v57 = vpop.f32.mrb[37].mxu0  ;;  %v3930_v58 = vrot.slane %v1115_v33, %v3788_v23  ;;  %3153 = vmatpush3.bf16.msra.mxu1 %v3323_v35  ;;  %v3327_v29 = vld [vmem:[%s4615_s3 + $0x98] sm:$0xff]  }
 0x19f   : > { %v1001_v59 = vadd.f32 %v1000_v34, %v999_v21  ;;  %v1013_v61 = vrot.slane %v1012_v39, 1  ;;  %v702_v48 = vadd.f32 %v3866_v36, %v3810_v24  ;;  %v3934_v45 = vpop.f32.mrb[34].mxu1  ;;  %v3936_v1 = vpop.f32.mrb[38].mxu0  ;;  %v921_v60 = vmin.f32 %v841_v7, 6.0  ;;  %v3325_v36 = vld [vmem:[%s4615_s3 + $0x18] sm:$0xff]  }
 0x1a0   : > { %v900_v8 = vmin.f32 %v820_v53, 6.0  ;;  %v922_v12 = vmin.f32 %v842_v54, 6.0  ;;  %v785_v13 = vadd.f32 %v3868_v37, %v3797_v38  ;;  %v3943_v14 = vpop.f32.mrb[35].mxu1  ;;  %v3945_v15 = vpop.f32.mrb[39].mxu0  ;;  %v704_v20 = vadd.f32 %v3874_v52, %v3813_v28  ;;  %v3326_v37 = vld [vmem:[%s4615_s3 + $0xd8] sm:$0xff]   ;;  %3133 = vmatpush3.bf16.msra.mxu0 %v3325_v36 }
 0x1a1   : > { %v1095_v9 = vmul.f32 0.015625, %v1001_v59  ;;  %v1014_v18 = vadd.f32 %v1013_v61, %v1012_v39  ;;  %v829_v19 = vmax.f32 %v702_v48, 0.0  ;;  %v1069_v21 = vadd.f32 %v1068_v63, %v921_v60  ;;  %3154 = vmatprep.subr.bf16.mxu1 %v3326_v37  ;;  %3134 = vmatprep.subr.bf16.mxu0 %v3328_v32 }
 0x1a2   : > { %v1054_v22 = vadd.f32 %v900_v8, %v890_v16  ;;  %v1082_v25 = vadd.f32 %v1081_v40, %v922_v12  ;;  %v851_v26 = vmax.f32 %v785_v13, 0.0  ;;  %v830_v31 = vmax.f32 %v704_v20, 0.0  ;;  %3155 = vmatpush3.bf16.msra.mxu1 %v3327_v29 }
 0x1a3   : > { %v1096_v27 = vmul.f32 0.015625, %v1014_v18  ;;  %v909_v30 = vmin.f32 %v829_v19, 6.0  ;;  %v787_v52 = vadd.f32 %v3876_v44, %v3799_v49  ;;  %v706_v16 = vadd.f32 %v3882_v43, %v3810_v24  ;;  %v3329_v44 = vld [vmem:[%s4615_s3 + $0x20] sm:$0xff]  }
 0x1a4   : > { %v931_v63 = vmin.f32 %v851_v26, 6.0  ;;  %v789_v33 = vadd.f32 %v3884_v62, %v3797_v38  ;;  %v708_v34 = vadd.f32 %v3890_v3, %v3813_v28  ;;  %v910_v0 = vmin.f32 %v830_v31, 6.0  ;;  %v3330_v43 = vld [vmem:[%s4615_s3 + $0xe0] sm:$0xff]   ;;  %3135 = vmatpush3.bf16.msra.mxu0 %v3329_v44 }
 0x1a5   : > { %v1114_v39 = vcombine.low %v1095_v9, %v1096_v27  ;;  %v1042_v40 = vadd.f32 %v1041_v6, %v909_v30  ;;  %v852_v7 = vmax.f32 %v787_v52, 0.0  ;;  %v3972_v53 = vpop.f32.mrb[36].mxu1  ;;  %v3974_v54 = vpop.f32.mrb[40].mxu0  ;;  %v839_v3 = vmax.f32 %v706_v16, 0.0  ;;  %v3331_v6 = vld [vmem:[%s4615_s3 + $0xa0] sm:$0xff]   ;;  %3156 = vmatprep.subr.bf16.mxu1 %v3330_v43  ;;  %v3332_v9 = vld [vmem:[%s4615_s3 + $0x68] sm:$0xff]  }
 0x1a6   : > { %v1070_v62 = vadd.f32 %v1069_v21, %v931_v63  ;;  %v861_v35 = vmax.f32 %v789_v33, 0.0  ;;  %v840_v59 = vmax.f32 %v708_v34, 0.0  ;;  %v3979_v61 = vpop.f32.mrb[37].mxu1  ;;  %v3981_v48 = vpop.f32.mrb[41].mxu0  ;;  %v1055_v60 = vadd.f32 %v1054_v22, %v910_v0  ;;  %3157 = vmatpush3.bf16.msra.mxu1 %v3331_v6  ;;  %3136 = vmatprep.subr.bf16.mxu0 %v3332_v9  ;;  %v3335_v16 = vld [vmem:[%s4615_s3 + $0xa8] sm:$0xff]   ;;  %v3336_v34 = vld [vmem:[%s4615_s3 + $0x70] sm:$0xff]  }
 0x1a7   : > { %v1130_v2 = vrot.slane %v1114_v39, %v3788_v23  ;;  %v932_v8 = vmin.f32 %v852_v7, 6.0  ;;  %v791_v12 = vadd.f32 %v3892_v4, %v3799_v49  ;;  %v3989_v13 = vpop.f32.mrb[38].mxu1  ;;  %v3991_v36 = vpop.f32.mrb[42].mxu0  ;;  %v919_v18 = vmin.f32 %v839_v3, 6.0  ;;  %v3333_v4 = vld [vmem:[%s4615_s3 + $0x28] sm:$0xff]  }
 0x1a8   : > { %v941_v19 = vmin.f32 %v861_v35, 6.0  ;;  %v920_v20 = vmin.f32 %v840_v59, 6.0  ;;  %v712_v37 = vadd.f32 %v3915_v50, %v3810_v24  ;;  %v3998_v21 = vpop.f32.mrb[39].mxu1  ;;  %v4000_v22 = vpop.f32.mrb[43].mxu0  ;;  %v795_v30 = vadd.f32 %v3917_v51, %v3797_v38  ;;  %v3334_v50 = vld [vmem:[%s4615_s3 + $0xe8] sm:$0xff]   ;;  %3137 = vmatpush3.bf16.msra.mxu0 %v3333_v4  ;;  %v3340_v4 = vld [vmem:[%s4615_s3 + $0x78] sm:$0xff]  }
 0x1a9   : > { %v1145_v26 = vcombine.low %v3836_v55, %v1130_v2  ;;  %v1083_v29 = vadd.f32 %v1082_v25, %v932_v8  ;;  %v862_v27 = vmax.f32 %v791_v12, 0.0  ;;  %v1043_v31 = vadd.f32 %v1042_v40, %v919_v18  ;;  %3158 = vmatprep.subr.bf16.mxu1 %v3334_v50  ;;  %3138 = vmatprep.subr.bf16.mxu0 %v3336_v34 }
 0x1aa   : > { %v1071_v52 = vadd.f32 %v1070_v62, %v941_v19  ;;  %v1056_v32 = vadd.f32 %v1055_v60, %v920_v20  ;;  %v849_v63 = vmax.f32 %v712_v37, 0.0  ;;  %v871_v33 = vmax.f32 %v795_v30, 0.0  ;;  %3159 = vmatpush3.bf16.msra.mxu1 %v3335_v16 }
 0x1ab   : > { %v4015_v55 = vrot.slane %v1145_v26, %v3788_v23  ;;  %v942_v25 = vmin.f32 %v862_v27, 6.0  ;;  %v714_v51 = vadd.f32 %v3922_v56, %v3813_v28  ;;  %v797_v39 = vadd.f32 %v3924_v57, %v3799_v49  ;;  %v3337_v56 = vld [vmem:[%s4615_s3 + $0x30] sm:$0xff]  }
 0x1ac   : > { %v929_v44 = vmin.f32 %v849_v63, 6.0  ;;  %v716_v40 = vadd.f32 %v3934_v45, %v3810_v24  ;;  %v799_v0 = vadd.f32 %v3936_v1, %v3797_v38  ;;  %v951_v43 = vmin.f32 %v871_v33, 6.0  ;;  %v3338_v45 = vld [vmem:[%s4615_s3 + $0xf0] sm:$0xff]   ;;  %3139 = vmatpush3.bf16.msra.mxu0 %v3337_v56  ;;  %v3344_v56 = vld [vmem:[%s4615_s3 + $0x140] sm:$0xff]  }
 0x1ad   : > { %v1084_v7 = vadd.f32 %v1083_v29, %v942_v25  ;;  %v850_v62 = vmax.f32 %v714_v51, 0.0  ;;  %v718_v3 = vadd.f32 %v3943_v14, %v3813_v28  ;;  %v4033_v35 = vpop.f32.mrb[40].mxu1  ;;  %v4035_v57 = vpop.f32.mrb[44].mxu0  ;;  %v872_v59 = vmax.f32 %v797_v39, 0.0  ;;  %v3339_v14 = vld [vmem:[%s4615_s3 + $0xb0] sm:$0xff]   ;;  %3160 = vmatprep.subr.bf16.mxu1 %v3338_v45  ;;  %3140 = vmatprep.subr.bf16.mxu0 %v3340_v4  ;;  %v3343_v39 = vld [vmem:[%s4615_s3 + $0xb8] sm:$0xff]  }
 0x1ae   : > { %v1044_v1 = vadd.f32 %v1043_v31, %v929_v44  ;;  %v859_v6 = vmax.f32 %v716_v40, 0.0  ;;  %v881_v2 = vmax.f32 %v799_v0, 0.0  ;;  %v4040_v60 = vpop.f32.mrb[41].mxu1  ;;  %v4042_v8 = vpop.f32.mrb[45].mxu0  ;;  %v1072_v12 = vadd.f32 %v1071_v52, %v951_v43  ;;  %3161 = vmatpush3.bf16.msra.mxu1 %v3339_v14  ;;  %v3347_v14 = vld [vmem:[%s4615_s3 + $0x1c0] sm:$0xff]  }
 0x1af   : > { %v930_v9 = vmin.f32 %v850_v62, 6.0  ;;  %v860_v18 = vmax.f32 %v718_v3, 0.0  ;;  %v801_v19 = vadd.f32 %v3945_v15, %v3799_v49  ;;  %v4049_v20 = vpop.f32.mrb[42].mxu1  ;;  %v4051_v37 = vpop.f32.mrb[46].mxu0  ;;  %v952_v26 = vmin.f32 %v872_v59, 6.0  ;;  %v3341_v15 = vld [vmem:[%s4615_s3 + $0x38] sm:$0xff]  }
 0x1b0   : > { %v939_v29 = vmin.f32 %v859_v6, 6.0  ;;  %v961_v27 = vmin.f32 %v881_v2, 6.0  ;;  %v722_v30 = vadd.f32 %v3972_v53, %v3810_v24  ;;  %v4058_v50 = vpop.f32.mrb[43].mxu1  ;;  %v4060_v31 = vpop.f32.mrb[47].mxu0  ;;  %v724_v25 = vadd.f32 %v3979_v61, %v3813_v28  ;;  %v3342_v53 = vld [vmem:[%s4615_s3 + $0xf8] sm:$0xff]   ;;  %3141 = vmatpush3.bf16.msra.mxu0 %v3341_v15 }
 0x1b1   : > { %v1057_v52 = vadd.f32 %v1056_v32, %v930_v9  ;;  %v940_v63 = vmin.f32 %v860_v18, 6.0  ;;  %v882_v16 = vmax.f32 %v801_v19, 0.0  ;;  %v1085_v33 = vadd.f32 %v1084_v7, %v952_v26  ;;  %3162 = vmatprep.subr.bf16.mxu1 %v3342_v53  ;;  %3170 = vmatprep.subr.bf16.mxu0 %v3344_v56 }
 0x1b2   : > { %v1045_v51 = vadd.f32 %v1044_v1, %v939_v29  ;;  %v1073_v34 = vadd.f32 %v1072_v12, %v961_v27  ;;  %v869_v44 = vmax.f32 %v722_v30, 0.0  ;;  %v870_v0 = vmax.f32 %v724_v25, 0.0  ;;  %3163 = vmatpush3.bf16.msra.mxu1 %v3343_v39 }
 0x1b3   : > { %v1058_v32 = vadd.f32 %v1057_v52, %v940_v63  ;;  %v962_v40 = vmin.f32 %v882_v16, 6.0  ;;  %v726_v61 = vadd.f32 %v3989_v13, %v3810_v24  ;;  %v728_v62 = vadd.f32 %v3998_v21, %v3813_v28  ;;  %3192 = vmatprep.subr.bf16.mxu1 %v3347_v14 }
 0x1b4   : > { %v1074_v7 = vrot.slane %v1073_v34, 4  ;;  %v949_v43 = vmin.f32 %v869_v44, 6.0  ;;  %v1329_v3 = vadd.f32 %v3974_v54, %v3778_v11  ;;  %v950_v1 = vmin.f32 %v870_v0, 6.0 }
 0x1b5   : > { %v1086_v45 = vadd.f32 %v1085_v33, %v962_v40  ;;  %v879_v59 = vmax.f32 %v726_v61, 0.0  ;;  %v1331_v13 = vadd.f32 %v3981_v48, %v3783_v17  ;;  %v4084_v6 = vpop.f32.mrb[44].mxu1  ;;  %v4086_v2 = vpop.f32.mrb[48].mxu0  ;;  %v880_v9 = vmax.f32 %v728_v62, 0.0 }
 0x1b6   : > { %v1075_v21 = vadd.f32 %v1074_v7, %v1073_v34  ;;  %v1046_v12 = vadd.f32 %v1045_v51, %v949_v43  ;;  %v1588_v54 = vmax.f32 %v1329_v3, 0.0  ;;  %v4091_v18 = vpop.f32.mrb[45].mxu1  ;;  %v4093_v19 = vpop.f32.mrb[49].mxu0  ;;  %v1059_v26 = vadd.f32 %v1058_v32, %v950_v1 }
 0x1b7   : > { %v1087_v4 = vrot.slane %v1086_v45, 4  ;;  %v959_v48 = vmin.f32 %v879_v59, 6.0  ;;  %v1589_v29 = vmax.f32 %v1331_v13, 0.0  ;;  %v4095_v27 = vpop.f32.mrb[46].mxu1  ;;  %v4097_v30 = vpop.f32.mrb[50].mxu0  ;;  %v960_v52 = vmin.f32 %v880_v9, 6.0 }
 0x1b8   : > { %v1076_v15 = vrot.slane %v1075_v21, 2  ;;  %v1668_v63 = vmin.f32 %v1588_v54, 6.0  ;;  %v1333_v16 = vadd.f32 %v3991_v36, %v3778_v11  ;;  %v4101_v25 = vpop.f32.mrb[47].mxu1  ;;  %v4103_v53 = vpop.f32.mrb[51].mxu0  ;;  %v1256_v44 = vadd.f32 %v4033_v35, %v3758_v46 }
 0x1b9   : > { %v1088_v33 = vadd.f32 %v1087_v4, %v1086_v45  ;;  %v1047_v51 = vadd.f32 %v1046_v12, %v959_v48  ;;  %v1669_v34 = vmin.f32 %v1589_v29, 6.0  ;;  %v1060_v32 = vadd.f32 %v1059_v26, %v960_v52 }
 0x1ba   : > { %v1077_v39 = vadd.f32 %v1076_v15, %v1075_v21  ;;  %v1598_v40 = vmax.f32 %v1333_v16, 0.0  ;;  %v1335_v0 = vadd.f32 %v4000_v22, %v3783_v17  ;;  %v1586_v7 = vmax.f32 %v1256_v44, 0.0 }
 0x1bb   : > { %v1089_v61 = vrot.slane %v1088_v33, 2  ;;  %v1048_v56 = vrot.slane %v1047_v51, 4  ;;  %v1258_v36 = vadd.f32 %v4040_v60, %v3761_v47  ;;  %v1061_v62 = vrot.slane %v1060_v32, 4 }
 0x1bc   : > { %v1078_v43 = vrot.slane %v1077_v39, 1  ;;  %v1678_v3 = vmin.f32 %v1598_v40, 6.0  ;;  %v1599_v45 = vmax.f32 %v1335_v0, 0.0  ;;  %v1666_v13 = vmin.f32 %v1586_v7, 6.0 }
 0x1bd   : > { %v1090_v1 = vadd.f32 %v1089_v61, %v1088_v33  ;;  %v1049_v59 = vadd.f32 %v1048_v56, %v1047_v51  ;;  %v1587_v35 = vmax.f32 %v1258_v36, 0.0  ;;  %v4111_v14 = vpop.f32.mrb[48].mxu1  ;;  %v4113_v21 = vpop.f32.mrb[52].mxu0  ;;  %v1062_v22 = vadd.f32 %v1061_v62, %v1060_v32  ;;  %v3357_v51 = vld [vmem:[%s4615_s3 + $0x190] sm:$0xff]  }
 0x1be   : > { %v1079_v12 = vadd.f32 %v1078_v43, %v1077_v39  ;;  %v1772_v9 = vadd.f32 %v1678_v3, %v1668_v63  ;;  %v1679_v54 = vmin.f32 %v1599_v45, 6.0  ;;  %v4115_v4 = vpop.f32.mrb[49].mxu1  ;;  %v4117_v26 = vpop.f32.mrb[53].mxu0  ;;  %v1339_v15 = vadd.f32 %v4035_v57, %v3778_v11 }
 0x1bf   : > { %v1091_v60 = vrot.slane %v1090_v1, 1  ;;  %v1050_v48 = vrot.slane %v1049_v59, 2  ;;  %v1667_v29 = vmin.f32 %v1587_v35, 6.0  ;;  %v4121_v52 = vpop.f32.mrb[50].mxu1  ;;  %v4123_v16 = vpop.f32.mrb[54].mxu0  ;;  %v1063_v63 = vrot.slane %v1062_v22, 2 }
 0x1c0   : > { %v1101_v33 = vmul.f32 0.015625, %v1079_v12  ;;  %v1785_v44 = vadd.f32 %v1679_v54, %v1669_v34  ;;  %v1260_v39 = vadd.f32 %v4049_v20, %v3758_v46  ;;  %v4132_v32 = vpop.f32.mrb[51].mxu1  ;;  %v4134_v40 = vpop.f32.mrb[55].mxu0  ;;  %v1608_v61 = vmax.f32 %v1339_v15, 0.0 }
 0x1c1   : > { %v1092_v57 = vadd.f32 %v1091_v60, %v1090_v1  ;;  %v1051_v0 = vadd.f32 %v1050_v48, %v1049_v59  ;;  %v1341_v56 = vadd.f32 %v4042_v8, %v3783_v17  ;;  %v1064_v7 = vadd.f32 %v1063_v63, %v1062_v22 }
 0x1c2   : > { %v1596_v41 = vmax.f32 %v1260_v39, 0.0  ;;  %v1262_v36 = vadd.f32 %v4058_v50, %v3761_v47  ;;  %v1343_v34 = vadd.f32 %v4051_v37, %v3778_v11  ;;  %v1688_v62 = vmin.f32 %v1608_v61, 6.0 }
 0x1c3   : > { %v1102_v43 = vmul.f32 0.015625, %v1092_v57  ;;  %v1052_v20 = vrot.slane %v1051_v0, 1  ;;  %v1609_v3 = vmax.f32 %v1341_v56, 0.0  ;;  %v1065_v45 = vrot.slane %v1064_v7, 1 }
 0x1c4   : > { %v1676_v35 = vmin.f32 %v1596_v41, 6.0  ;;  %v1597_v1 = vmax.f32 %v1262_v36, 0.0  ;;  %v1618_v59 = vmax.f32 %v1343_v34, 0.0  ;;  %v1773_v60 = vadd.f32 %v1772_v9, %v1688_v62 }
 0x1c5   : > { %v1162_v12 = vcombine.low %v1101_v33, %v1102_v43  ;;  %v1053_v54 = vadd.f32 %v1052_v20, %v1051_v0  ;;  %v1689_v8 = vmin.f32 %v1609_v3, 6.0  ;;  %v4142_v22 = vpop.f32.mrb[52].mxu1  ;;  %v4144_v48 = vpop.f32.mrb[56].mxu0  ;;  %v1066_v50 = vadd.f32 %v1065_v45, %v1064_v7 }
 0x1c6   : > { %v1746_v15 = vadd.f32 %v1676_v35, %v1666_v13  ;;  %v1677_v63 = vmin.f32 %v1597_v1, 6.0  ;;  %v1698_v37 = vmin.f32 %v1618_v59, 6.0  ;;  %v4146_v39 = vpop.f32.mrb[53].mxu1  ;;  %v4148_v57 = vpop.f32.mrb[57].mxu0  ;;  %v1345_v9 = vadd.f32 %v4060_v31, %v3783_v17 }
 0x1c7   : > { %v1169_v61 = vrot.slane %v1162_v12, %v3788_v23  ;;  %v1099_v56 = vmul.f32 0.015625, %v1053_v54  ;;  %v1786_v41 = vadd.f32 %v1785_v44, %v1689_v8  ;;  %v4153_v33 = vpop.f32.mrb[54].mxu1  ;;  %v4155_v0 = vpop.f32.mrb[58].mxu0  ;;  %v1100_v36 = vmul.f32 0.015625, %v1066_v50 }
 0x1c8   : > { %v1759_v7 = vadd.f32 %v1677_v63, %v1667_v29  ;;  %v1774_v13 = vadd.f32 %v1773_v60, %v1698_v37  ;;  %v1266_v34 = vadd.f32 %v4084_v6, %v3758_v46  ;;  %v4159_v43 = vpop.f32.mrb[55].mxu1  ;;  %v4161_v20 = vpop.f32.mrb[59].mxu0  ;;  %v1619_v44 = vmax.f32 %v1345_v9, 0.0 }
 0x1c9   : > { %v1176_v62 = vrot.slane %v1169_v61, %v3788_v23  ;;  %v1349_v31 = vadd.f32 %v4086_v2, %v3778_v11  ;;  %v1268_v3 = vadd.f32 %v4091_v18, %v3761_v47  ;;  %v1116_v45 = vcombine.low %v1099_v56, %v1100_v36 }
 0x1ca   : > { %v1606_v35 = vmax.f32 %v1266_v34, 0.0  ;;  %v1351_v29 = vadd.f32 %v4093_v19, %v3783_v17  ;;  %v1270_v6 = vadd.f32 %v4095_v27, %v3758_v46  ;;  %v1699_v1 = vmin.f32 %v1619_v44, 6.0 }
 0x1cb   : > { %1185 = vst.msk [vmem:[#allocation2 + $0x10] ss:$2 sm:$0x3] %vm4126_vm1, %v1176_v62  ;;  %v1628_v59 = vmax.f32 %v1349_v31, 0.0  ;;  %v1607_v12 = vmax.f32 %v1268_v3, 0.0  ;;  %v1353_v2 = vadd.f32 %v4097_v30, %v3778_v11  ;;  %v1144_v54 = vrot.slane %v1116_v45, %v3788_v23 }
 0x1cc   : > { %v1686_v18 = vmin.f32 %v1606_v35, 6.0  ;;  %v1629_v60 = vmax.f32 %v1351_v29, 0.0  ;;  %v1616_v8 = vmax.f32 %v1270_v6, 0.0  ;;  %v1787_v50 = vadd.f32 %v1786_v41, %v1699_v1 }
 0x1cd   : > { %v1708_v63 = vmin.f32 %v1628_v59, 6.0  ;;  %v1687_v19 = vmin.f32 %v1607_v12, 6.0  ;;  %v1638_v37 = vmax.f32 %v1353_v2, 0.0  ;;  %v4177_v61 = vpop.f32.mrb[56].mxu1  ;;  %v4179_v27 = vpop.f32.mrb[60].mxu0  ;;  %v1146_v56 = vcombine.low %v3930_v58, %v1144_v54 }
 0x1ce   : > { %v1747_v9 = vadd.f32 %v1746_v15, %v1686_v18  ;;  %v1709_v36 = vmin.f32 %v1629_v60, 6.0  ;;  %v1696_v34 = vmin.f32 %v1616_v8, 6.0  ;;  %v4182_v62 = vpop.f32.mrb[57].mxu1  ;;  %v4184_v30 = vpop.f32.mrb[61].mxu0  ;;  %v1272_v41 = vadd.f32 %v4101_v25, %v3761_v47 }
 0x1cf   : > { %v1775_v44 = vadd.f32 %v1774_v13, %v1708_v63  ;;  %v1760_v31 = vadd.f32 %v1759_v7, %v1687_v19  ;;  %v1718_v3 = vmin.f32 %v1638_v37, 6.0  ;;  %v4188_v45 = vpop.f32.mrb[58].mxu1  ;;  %v4190_v35 = vpop.f32.mrb[62].mxu0  ;;  %v1160_v29 = vrot.slane %v1146_v56, %v3788_v23 }
 0x1d0   : > { %v1788_v58 = vadd.f32 %v1787_v50, %v1709_v36  ;;  %v1748_v15 = vadd.f32 %v1747_v9, %v1696_v34  ;;  %v1355_v6 = vadd.f32 %v4103_v53, %v3783_v17  ;;  %v4195_v1 = vpop.f32.mrb[59].mxu1  ;;  %v4197_v59 = vpop.f32.mrb[63].mxu0  ;;  %v1617_v13 = vmax.f32 %v1272_v41, 0.0 }
 0x1d1   : > { %v1776_v7 = vadd.f32 %v1775_v44, %v1718_v3  ;;  %v1276_v25 = vadd.f32 %v4111_v14, %v3758_v46  ;;  %v1359_v12 = vadd.f32 %v4113_v21, %v3778_v11  ;;  %v1161_v2 = vcombine.low %v4015_v55, %v1160_v29 }
 0x1d2   : > { %v1639_v54 = vmax.f32 %v1355_v6, 0.0  ;;  %v1278_v18 = vadd.f32 %v4115_v4, %v3761_v47  ;;  %v1361_v53 = vadd.f32 %v4117_v26, %v3783_v17  ;;  %v1697_v60 = vmin.f32 %v1617_v13, 6.0 }
 0x1d3   : > { %v1626_v8 = vmax.f32 %v1276_v25, 0.0  ;;  %v1648_v50 = vmax.f32 %v1359_v12, 0.0  ;;  %v1280_v63 = vadd.f32 %v4121_v52, %v3758_v46  ;;  %1179 = vst [vmem:[#allocation2] ss:$2 sm:$0xff] %v1161_v2  ;;  %v1363_v55 = vadd.f32 %v4123_v16, %v3778_v11 }
 0x1d4   : > { %v1719_v14 = vmin.f32 %v1639_v54, 6.0  ;;  %v1627_v19 = vmax.f32 %v1278_v18, 0.0  ;;  %v1649_v37 = vmax.f32 %v1361_v53, 0.0  ;;  %v1761_v21 = vadd.f32 %v1760_v31, %v1697_v60 }
 0x1d5   : > { %v1706_v56 = vmin.f32 %v1626_v8, 6.0  ;;  %v1728_v9 = vmin.f32 %v1648_v50, 6.0  ;;  %v1636_v4 = vmax.f32 %v1280_v63, 0.0  ;;  %v4212_v36 = vpop.f32.mrb[60].mxu1  ;;  %v4214_v26 = vpop.f32.mrb[64].mxu0  ;;  %v1658_v41 = vmax.f32 %v1363_v55, 0.0 }
 0x1d6   : > { %v1789_v34 = vadd.f32 %v1788_v58, %v1719_v14  ;;  %v1707_v44 = vmin.f32 %v1627_v19, 6.0  ;;  %v1729_v3 = vmin.f32 %v1649_v37, 6.0  ;;  %v4216_v52 = vpop.f32.mrb[61].mxu1  ;;  %v4218_v29 = vpop.f32.mrb[65].mxu0  ;;  %v1282_v11 = vadd.f32 %v4132_v32, %v3761_v47 }
 0x1d7   : > { %v1749_v6 = vadd.f32 %v1748_v15, %v1706_v56  ;;  %v1777_v13 = vadd.f32 %v1776_v7, %v1728_v9  ;;  %v1716_v25 = vmin.f32 %v1636_v4, 6.0  ;;  %v4222_v16 = vpop.f32.mrb[62].mxu1  ;;  %v4224_v31 = vpop.f32.mrb[66].mxu0  ;;  %v1738_v58 = vmin.f32 %v1658_v41, 6.0 }
 0x1d8   : > { %v1762_v12 = vadd.f32 %v1761_v21, %v1707_v44  ;;  %v1790_v2 = vadd.f32 %v1789_v34, %v1729_v3  ;;  %v1365_v54 = vadd.f32 %v4134_v40, %v3783_v17  ;;  %v4228_v18 = vpop.f32.mrb[63].mxu1  ;;  %v4230_v53 = vpop.f32.mrb[67].mxu0  ;;  %v1637_v7 = vmax.f32 %v1282_v11, 0.0 }
 0x1d9   : > { %v1750_v15 = vadd.f32 %v1749_v6, %v1716_v25  ;;  %v1286_v60 = vadd.f32 %v4142_v22, %v3758_v46  ;;  %v1475_v32 = vadd.f32 %v4144_v48, %v3810_v24  ;;  %v1778_v8 = vadd.f32 %v1777_v13, %v1738_v58 }
 0x1da   : > { %v1659_v50 = vmax.f32 %v1365_v54, 0.0  ;;  %v1288_v63 = vadd.f32 %v4146_v39, %v3761_v47  ;;  %v1477_v17 = vadd.f32 %v4148_v57, %v3813_v28  ;;  %v1717_v40 = vmin.f32 %v1637_v7, 6.0 }
 0x1db   : > { %v1646_v14 = vmax.f32 %v1286_v60, 0.0  ;;  %v1592_v19 = vmax.f32 %v1475_v32, 0.0  ;;  %v1290_v37 = vadd.f32 %v4153_v33, %v3758_v46  ;;  %v1779_v55 = vrot.slane %v1778_v8, 4 }
 0x1dc   : > { %v1739_v21 = vmin.f32 %v1659_v50, 6.0  ;;  %v1647_v22 = vmax.f32 %v1288_v63, 0.0  ;;  %v1593_v56 = vmax.f32 %v1477_v17, 0.0  ;;  %v1763_v9 = vadd.f32 %v1762_v12, %v1717_v40 }
 0x1dd   : > { %v1726_v48 = vmin.f32 %v1646_v14, 6.0  ;;  %v1672_v4 = vmin.f32 %v1592_v19, 6.0  ;;  %v1656_v34 = vmax.f32 %v1290_v37, 0.0  ;;  %v4242_v44 = vpop.f32.mrb[64].mxu1  ;;  %v4244_v39 = vpop.f32.mrb[68].mxu0  ;;  %v1780_v3 = vadd.f32 %v1779_v55, %v1778_v8 }
 0x1de   : > { %v1791_v57 = vadd.f32 %v1790_v2, %v1739_v21  ;;  %v1727_v41 = vmin.f32 %v1647_v22, 6.0  ;;  %v1673_v6 = vmin.f32 %v1593_v56, 6.0  ;;  %v4246_v13 = vpop.f32.mrb[65].mxu1  ;;  %v4248_v25 = vpop.f32.mrb[69].mxu0  ;;  %v1479_v11 = vadd.f32 %v4155_v0, %v3810_v24 }
 0x1df   : > { %v1751_v46 = vadd.f32 %v1750_v15, %v1726_v48  ;;  %v1736_v33 = vmin.f32 %v1656_v34, 6.0  ;;  %v1292_v12 = vadd.f32 %v4159_v43, %v3761_v47  ;;  %v4254_v58 = vpop.f32.mrb[66].mxu1  ;;  %v4256_v54 = vpop.f32.mrb[70].mxu0  ;;  %v1781_v7 = vrot.slane %v1780_v3, 2 }
 0x1e0   : > { %v1792_v2 = vrot.slane %v1791_v57, 4  ;;  %v1764_v60 = vadd.f32 %v1763_v9, %v1727_v41  ;;  %v1481_v32 = vadd.f32 %v4161_v20, %v3813_v28  ;;  %v4260_v8 = vpop.f32.mrb[67].mxu1  ;;  %v4262_v15 = vpop.f32.mrb[71].mxu0  ;;  %v1602_v63 = vmax.f32 %v1479_v11, 0.0 }
 0x1e1   : > { %v1752_v50 = vadd.f32 %v1751_v46, %v1736_v33  ;;  %v1657_v0 = vmax.f32 %v1292_v12, 0.0  ;;  %v1402_v47 = vadd.f32 %v4177_v61, %v3772_v5  ;;  %v1782_v43 = vadd.f32 %v1781_v7, %v1780_v3 }
 0x1e2   : > { %v1793_v17 = vadd.f32 %v1792_v2, %v1791_v57  ;;  %v1603_v40 = vmax.f32 %v1481_v32, 0.0  ;;  %v1485_v14 = vadd.f32 %v4179_v27, %v3810_v24  ;;  %v1682_v37 = vmin.f32 %v1602_v63, 6.0 }
 0x1e3   : > { %v1753_v19 = vrot.slane %v1752_v50, 4  ;;  %v1737_v55 = vmin.f32 %v1657_v0, 6.0  ;;  %v1590_v20 = vmax.f32 %v1402_v47, 0.0  ;;  %v1783_v21 = vrot.slane %v1782_v43, 1 }
 0x1e4   : > { %v1794_v22 = vrot.slane %v1793_v17, 2  ;;  %v1683_v56 = vmin.f32 %v1603_v40, 6.0  ;;  %v1612_v9 = vmax.f32 %v1485_v14, 0.0  ;;  %v1824_v34 = vadd.f32 %v1682_v37, %v1672_v4 }
 0x1e5   : > { %v1754_v48 = vadd.f32 %v1753_v19, %v1752_v50  ;;  %v1765_v41 = vadd.f32 %v1764_v60, %v1737_v55  ;;  %v1670_v46 = vmin.f32 %v1590_v20, 6.0  ;;  %v4268_v33 = vpop.f32.mrb[68].mxu1  ;;  %v1784_v61 = vadd.f32 %v1783_v21, %v1782_v43 }
 0x1e6   : > { %v1795_v3 = vadd.f32 %v1794_v22, %v1793_v17  ;;  %v1837_v57 = vadd.f32 %v1683_v56, %v1673_v6  ;;  %v1692_v11 = vmin.f32 %v1612_v9, 6.0  ;;  %v4270_v12 = vpop.f32.mrb[69].mxu1  ;;  %v1404_v2 = vadd.f32 %v4182_v62, %v3775_v10 }
 0x1e7   : > { %v1755_v27 = vrot.slane %v1754_v48, 2  ;;  %v1766_v7 = vrot.slane %v1765_v41, 4  ;;  %v1487_v32 = vadd.f32 %v4184_v30, %v3813_v28  ;;  %v4276_v50 = vpop.f32.mrb[70].mxu1  ;;  %v1878_v4 = vmul.f32 0.015625, %v1784_v61 }
 0x1e8   : > { %v1796_v60 = vrot.slane %v1795_v3, 1  ;;  %v1825_v63 = vadd.f32 %v1824_v34, %v1692_v11  ;;  %v1406_v0 = vadd.f32 %v4188_v45, %v3772_v5  ;;  %v4280_v6 = vpop.f32.mrb[71].mxu1  ;;  %v1591_v17 = vmax.f32 %v1404_v2, 0.0 }
 0x1e9   : > { %v1756_v47 = vadd.f32 %v1755_v27, %v1754_v48  ;;  %v1767_v43 = vadd.f32 %v1766_v7, %v1765_v41  ;;  %v1613_v40 = vmax.f32 %v1487_v32, 0.0  ;;  %v1489_v62 = vadd.f32 %v4190_v35, %v3810_v24 }
 0x1ea   : > { %v1797_v14 = vadd.f32 %v1796_v60, %v1795_v3  ;;  %v1600_v19 = vmax.f32 %v1406_v0, 0.0  ;;  %v1408_v30 = vadd.f32 %v4195_v1, %v3775_v10  ;;  %v1671_v20 = vmin.f32 %v1591_v17, 6.0 }
 0x1eb   : > { %v1757_v37 = vrot.slane %v1756_v47, 1  ;;  %v1768_v55 = vrot.slane %v1767_v43, 2  ;;  %v1693_v21 = vmin.f32 %v1613_v40, 6.0  ;;  %v1622_v56 = vmax.f32 %v1489_v62, 0.0 }
 0x1ec   : > { %v1879_v22 = vmul.f32 0.015625, %v1797_v14  ;;  %v1680_v45 = vmin.f32 %v1600_v19, 6.0  ;;  %v1601_v9 = vmax.f32 %v1408_v30, 0.0  ;;  %v1491_v61 = vadd.f32 %v4197_v59, %v3813_v28 }
 0x1ed   : > { %v1758_v48 = vadd.f32 %v1757_v37, %v1756_v47  ;;  %v1769_v34 = vadd.f32 %v1768_v55, %v1767_v43  ;;  %v1838_v41 = vadd.f32 %v1837_v57, %v1693_v21  ;;  %v4288_v3 = vpop.f32.mrb[72].mxu1  ;;  %v1702_v27 = vmin.f32 %v1622_v56, 6.0 }
 0x1ee   : > { %v1897_v35 = vcombine.low %v1878_v4, %v1879_v22  ;;  %v1798_v11 = vadd.f32 %v1680_v45, %v1670_v46  ;;  %v1681_v1 = vmin.f32 %v1601_v9, 6.0  ;;  %v4290_v7 = vpop.f32.mrb[73].mxu1  ;;  %v1623_v60 = vmax.f32 %v1491_v61, 0.0 }
 0x1ef   : > { %v1876_v2 = vmul.f32 0.015625, %v1758_v48  ;;  %v1770_v32 = vrot.slane %v1769_v34, 1  ;;  %v1412_v0 = vadd.f32 %v4212_v36, %v3772_v5  ;;  %v4294_v47 = vpop.f32.mrb[74].mxu1  ;;  %v1826_v59 = vadd.f32 %v1825_v63, %v1702_v27 }
 0x1f0   : > { %v4297_v57 = vrot.slane %v1897_v35, %v3788_v23  ;;  %v1811_v43 = vadd.f32 %v1681_v1, %v1671_v20  ;;  %v1495_v46 = vadd.f32 %v4214_v26, %v3810_v24  ;;  %v4301_v4 = vpop.f32.mrb[75].mxu1  ;;  %v1703_v40 = vmin.f32 %v1623_v60, 6.0 }
 0x1f1   : > { %v1771_v17 = vadd.f32 %v1770_v32, %v1769_v34  ;;  %v1610_v14 = vmax.f32 %v1412_v0, 0.0  ;;  %v1414_v19 = vadd.f32 %v4216_v52, %v3775_v10  ;;  %v1497_v36 = vadd.f32 %v4218_v29, %v3813_v28 }
 0x1f2   : > { %v1632_v62 = vmax.f32 %v1495_v46, 0.0  ;;  %v1416_v30 = vadd.f32 %v4222_v16, %v3772_v5  ;;  %v1499_v63 = vadd.f32 %v4224_v31, %v3810_v24  ;;  %v1839_v26 = vadd.f32 %v1838_v41, %v1703_v40 }
 0x1f3   : > { %v1877_v37 = vmul.f32 0.015625, %v1771_v17  ;;  %v1690_v55 = vmin.f32 %v1610_v14, 6.0  ;;  %v1611_v20 = vmax.f32 %v1414_v19, 0.0  ;;  %v1633_v22 = vmax.f32 %v1497_v36, 0.0 }
 0x1f4   : > { %v1712_v21 = vmin.f32 %v1632_v62, 6.0  ;;  %v1620_v45 = vmax.f32 %v1416_v30, 0.0  ;;  %v1642_v56 = vmax.f32 %v1499_v63, 0.0  ;;  %v1418_v29 = vadd.f32 %v4228_v18, %v3775_v10 }
 0x1f5   : > { %v1896_v9 = vcombine.low %v1876_v2, %v1877_v37  ;;  %v1799_v52 = vadd.f32 %v1798_v11, %v1690_v55  ;;  %v1691_v48 = vmin.f32 %v1611_v20, 6.0  ;;  %v4313_v34 = vpop.f32.mrb[76].mxu1  ;;  %v1713_v61 = vmin.f32 %v1633_v22, 6.0 }
 0x1f6   : > { %v1827_v16 = vadd.f32 %v1826_v59, %v1712_v21  ;;  %v1700_v35 = vmin.f32 %v1620_v45, 6.0  ;;  %v1722_v31 = vmin.f32 %v1642_v56, 6.0  ;;  %v4315_v27 = vpop.f32.mrb[77].mxu1  ;;  %v1621_v32 = vmax.f32 %v1418_v29, 0.0 }
 0x1f7   : > { %v4318_v41 = vrot.slane %v1896_v9, %v3788_v23  ;;  %v1812_v1 = vadd.f32 %v1811_v43, %v1691_v48  ;;  %v1501_v11 = vadd.f32 %v4230_v53, %v3813_v28  ;;  %v4322_v2 = vpop.f32.mrb[78].mxu1  ;;  %v1840_v60 = vadd.f32 %v1839_v26, %v1713_v61 }
 0x1f8   : > { %v1800_v18 = vadd.f32 %v1799_v52, %v1700_v35  ;;  %v1828_v0 = vadd.f32 %v1827_v16, %v1722_v31  ;;  %v1422_v59 = vadd.f32 %v4242_v44, %v3772_v5  ;;  %v4326_v46 = vpop.f32.mrb[79].mxu1  ;;  %v1701_v40 = vmin.f32 %v1621_v32, 6.0 }
 0x1f9   : > { %v1928_v17 = vcombine.low %v4318_v41, %v4297_v57  ;;  %v1643_v14 = vmax.f32 %v1501_v11, 0.0  ;;  %v1505_v43 = vadd.f32 %v4244_v39, %v3810_v24  ;;  %v1424_v53 = vadd.f32 %v4246_v13, %v3775_v10 }
 0x1fa   : > { %v1630_v19 = vmax.f32 %v1422_v59, 0.0  ;;  %v1507_v62 = vadd.f32 %v4248_v25, %v3813_v28  ;;  %v1426_v44 = vadd.f32 %v4254_v58, %v3772_v5  ;;  %v1813_v36 = vadd.f32 %v1812_v1, %v1701_v40 }
 0x1fb   : > { %v1723_v30 = vmin.f32 %v1643_v14, 6.0  ;;  %v1652_v63 = vmax.f32 %v1505_v43, 0.0  ;;  %v1631_v26 = vmax.f32 %v1424_v53, 0.0  ;;  %v1509_v39 = vadd.f32 %v4256_v54, %v3810_v24 }
 0x1fc   : > { %v1710_v37 = vmin.f32 %v1630_v19, 6.0  ;;  %v1653_v55 = vmax.f32 %v1507_v62, 0.0  ;;  %v1640_v20 = vmax.f32 %v1426_v44, 0.0  ;;  %v1428_v13 = vadd.f32 %v4260_v8, %v3775_v10 }
 0x1fd   : > { %v1841_v21 = vadd.f32 %v1840_v60, %v1723_v30  ;;  %v1732_v22 = vmin.f32 %v1652_v63, 6.0  ;;  %v4342_v45 = vpop.f32.mrb[80].mxu1  ;;  %v1711_v56 = vmin.f32 %v1631_v26, 6.0  ;;  %v1662_v29 = vmax.f32 %v1509_v39, 0.0 }
 0x1fe   : > { %v1801_v25 = vadd.f32 %v1800_v18, %v1710_v37  ;;  %v1733_v58 = vmin.f32 %v1653_v55, 6.0  ;;  %v1720_v9 = vmin.f32 %v1640_v20, 6.0  ;;  %v4344_v52 = vpop.f32.mrb[81].mxu1  ;;  %v1641_v16 = vmax.f32 %v1428_v13, 0.0 }
 0x1ff   : > { %v1829_v48 = vadd.f32 %v1828_v0, %v1732_v22  ;;  %v1511_v61 = vadd.f32 %v4262_v15, %v3813_v28  ;;  %v4348_v35 = vpop.f32.mrb[82].mxu1  ;;  %v1814_v24 = vadd.f32 %v1813_v36, %v1711_v56  ;;  %v1432_v8 = vadd.f32 %v4268_v33, %v3772_v5 }
 0x200   : > { %v1842_v54 = vadd.f32 %v1841_v21, %v1733_v58  ;;  %v1802_v31 = vadd.f32 %v1801_v25, %v1720_v9  ;;  %v4352_v1 = vpop.f32.mrb[83].mxu1  ;;  %v1742_v32 = vmin.f32 %v1662_v29, 6.0  ;;  %v1721_v11 = vmin.f32 %v1641_v16, 6.0 }
 0x201   : > { %v1663_v60 = vmax.f32 %v1511_v61, 0.0  ;;  %v1434_v18 = vadd.f32 %v4270_v12, %v3775_v10  ;;  %v1650_v0 = vmax.f32 %v1432_v8, 0.0  ;;  %v1436_v28 = vadd.f32 %v4276_v50, %v3772_v5 }
 0x202   : > { %v1438_v15 = vadd.f32 %v4280_v6, %v3775_v10  ;;  %v1548_v59 = vadd.f32 %v4288_v3, %v3797_v38  ;;  %v1830_v40 = vadd.f32 %v1829_v48, %v1742_v32  ;;  %v1815_v33 = vadd.f32 %v1814_v24, %v1721_v11 }
 0x203   : > { %v1743_v14 = vmin.f32 %v1663_v60, 6.0  ;;  %v1651_v43 = vmax.f32 %v1434_v18, 0.0  ;;  %v1730_v19 = vmin.f32 %v1650_v0, 6.0  ;;  %v1660_v53 = vmax.f32 %v1436_v28, 0.0 }
 0x204   : > { %v1661_v62 = vmax.f32 %v1438_v15, 0.0  ;;  %v1594_v44 = vmax.f32 %v1548_v59, 0.0  ;;  %v1831_v36 = vrot.slane %v1830_v40, 4  ;;  %v1550_v5 = vadd.f32 %v4290_v7, %v3799_v49 }
 0x205   : > { %v1843_v12 = vadd.f32 %v1842_v54, %v1743_v14  ;;  %v1731_v30 = vmin.f32 %v1651_v43, 6.0  ;;  %v4364_v50 = vpop.f32.mrb[84].mxu1  ;;  %v1803_v10 = vadd.f32 %v1802_v31, %v1730_v19  ;;  %v1740_v6 = vmin.f32 %v1660_v53, 6.0 }
 0x206   : > { %v1741_v63 = vmin.f32 %v1661_v62, 6.0  ;;  %v1674_v3 = vmin.f32 %v1594_v44, 6.0  ;;  %v4366_v37 = vpop.f32.mrb[85].mxu1  ;;  %v1832_v26 = vadd.f32 %v1831_v36, %v1830_v40  ;;  %v1595_v21 = vmax.f32 %v1550_v5, 0.0 }
 0x207   : > { %v1844_v55 = vrot.slane %v1843_v12, 4  ;;  %v1816_v20 = vadd.f32 %v1815_v33, %v1731_v30  ;;  %v4368_v22 = vpop.f32.mrb[86].mxu1  ;;  %v1804_v39 = vadd.f32 %v1803_v10, %v1740_v6  ;;  %v1552_v13 = vadd.f32 %v4294_v47, %v3797_v38 }
 0x208   : > { %v1554_v7 = vadd.f32 %v4301_v4, %v3799_v49  ;;  %v1558_v25 = vadd.f32 %v4313_v34, %v3797_v38  ;;  %v4376_v56 = vpop.f32.mrb[87].mxu1  ;;  %v1833_v58 = vrot.slane %v1832_v26, 2  ;;  %v1675_v29 = vmin.f32 %v1595_v21, 6.0 }
 0x209   : > { %v1845_v9 = vadd.f32 %v1844_v55, %v1843_v12  ;;  %v1817_v48 = vadd.f32 %v1816_v20, %v1741_v63  ;;  %v1805_v16 = vrot.slane %v1804_v39, 4  ;;  %v1604_v61 = vmax.f32 %v1552_v13, 0.0 }
 0x20a   : > { %v1605_v24 = vmax.f32 %v1554_v7, 0.0  ;;  %v1614_v54 = vmax.f32 %v1558_v25, 0.0  ;;  %v1834_v31 = vadd.f32 %v1833_v58, %v1832_v26  ;;  %v1560_v47 = vadd.f32 %v4315_v27, %v3799_v49 }
 0x20b   : > { %v1846_v8 = vrot.slane %v1845_v9, 2  ;;  %v1818_v32 = vrot.slane %v1817_v48, 4  ;;  %v1806_v4 = vadd.f32 %v1805_v16, %v1804_v39  ;;  %v1684_v11 = vmin.f32 %v1604_v61, 6.0 }
 0x20c   : > { %v1685_v60 = vmin.f32 %v1605_v24, 6.0  ;;  %v1694_v34 = vmin.f32 %v1614_v54, 6.0  ;;  %v1835_v18 = vrot.slane %v1834_v31, 1  ;;  %v1615_v15 = vmax.f32 %v1560_v47, 0.0 }
 0x20d   : > { %v1847_v0 = vadd.f32 %v1846_v8, %v1845_v9  ;;  %v1819_v28 = vadd.f32 %v1818_v32, %v1817_v48  ;;  %v1807_v59 = vrot.slane %v1806_v4, 2  ;;  %v1850_v40 = vadd.f32 %v1684_v11, %v1674_v3 }
 0x20e   : > { %v1863_v33 = vadd.f32 %v1685_v60, %v1675_v29  ;;  %v1562_v14 = vadd.f32 %v4322_v2, %v3797_v38  ;;  %v1836_v43 = vadd.f32 %v1835_v18, %v1834_v31  ;;  %v1695_v62 = vmin.f32 %v1615_v15, 6.0 }
 0x20f   : > { %v1848_v19 = vrot.slane %v1847_v0, 1  ;;  %v1820_v53 = vrot.slane %v1819_v28, 2  ;;  %v1808_v44 = vadd.f32 %v1807_v59, %v1806_v4  ;;  %v1851_v27 = vadd.f32 %v1850_v40, %v1694_v34 }
 0x210   : > { %v1624_v36 = vmax.f32 %v1562_v14, 0.0  ;;  %v1564_v12 = vadd.f32 %v4326_v46, %v3799_v49  ;;  %v1882_v30 = vmul.f32 0.015625, %v1836_v43  ;;  %v1864_v6 = vadd.f32 %v1863_v33, %v1695_v62 }
 0x211   : > { %v1849_v5 = vadd.f32 %v1848_v19, %v1847_v0  ;;  %v1821_v10 = vadd.f32 %v1820_v53, %v1819_v28  ;;  %v1809_v63 = vrot.slane %v1808_v44, 1  ;;  %v1568_v2 = vadd.f32 %v4342_v45, %v3797_v38 }
 0x212   : > { %v1704_v3 = vmin.f32 %v1624_v36, 6.0  ;;  %v1625_v26 = vmax.f32 %v1564_v12, 0.0  ;;  %v1570_v21 = vadd.f32 %v4344_v52, %v3799_v49  ;;  %v1572_v39 = vadd.f32 %v4348_v35, %v3797_v38 }
 0x213   : > { %v1883_v55 = vmul.f32 0.015625, %v1849_v5  ;;  %v1822_v20 = vrot.slane %v1821_v10, 1  ;;  %v1810_v13 = vadd.f32 %v1809_v63, %v1808_v44  ;;  %v1634_v25 = vmax.f32 %v1568_v2, 0.0 }
 0x214   : > { %v1852_v46 = vadd.f32 %v1851_v27, %v1704_v3  ;;  %v1705_v7 = vmin.f32 %v1625_v26, 6.0  ;;  %v1635_v48 = vmax.f32 %v1570_v21, 0.0  ;;  %v1644_v29 = vmax.f32 %v1572_v39, 0.0 }
 0x215   : > { %v1899_v58 = vcombine.low %v1882_v30, %v1883_v55  ;;  %v1823_v9 = vadd.f32 %v1822_v20, %v1821_v10  ;;  %v1880_v16 = vmul.f32 0.015625, %v1810_v13  ;;  %v1714_v24 = vmin.f32 %v1634_v25, 6.0 }
 0x216   : > { %v1865_v61 = vadd.f32 %v1864_v6, %v1705_v7  ;;  %v1574_v45 = vadd.f32 %v4352_v1, %v3799_v49  ;;  %v1715_v31 = vmin.f32 %v1635_v48, 6.0  ;;  %v1724_v52 = vmin.f32 %v1644_v29, 6.0 }
 0x217   : > { %v1881_v54 = vmul.f32 0.015625, %v1823_v9  ;;  %v1853_v8 = vadd.f32 %v1852_v46, %v1714_v24  ;;  %v1578_v35 = vadd.f32 %v4364_v50, %v3797_v38  ;;  %v1580_v47 = vadd.f32 %v4366_v37, %v3799_v49 }
 0x218   : > { %v1645_v32 = vmax.f32 %v1574_v45, 0.0  ;;  %v1866_v11 = vadd.f32 %v1865_v61, %v1715_v31  ;;  %v1582_v60 = vadd.f32 %v4368_v22, %v3797_v38  ;;  %v1584_v34 = vadd.f32 %v4376_v56, %v3799_v49  ;;  %v3345_v45 = vld [vmem:[%s4615_s3 + $0x100] sm:$0xff]  }
 0x219   : > { %v1898_v4 = vcombine.low %v1880_v16, %v1881_v54  ;;  %v1854_v1 = vadd.f32 %v1853_v8, %v1724_v52  ;;  %v1654_v0 = vmax.f32 %v1578_v35, 0.0  ;;  %v1655_v28 = vmax.f32 %v1580_v47, 0.0  ;;  %v3348_v35 = vld [vmem:[%s4615_s3 + $0x180] sm:$0xff]   ;;  %v3349_v47 = vld [vmem:[%s4615_s3 + $0x148] sm:$0xff]  }
 0x21a   : > { %v1725_v18 = vmin.f32 %v1645_v32, 6.0  ;;  %v1927_v15 = vrot.slane %v1899_v58, %v3788_v23  ;;  %v1664_v50 = vmax.f32 %v1582_v60, 0.0  ;;  %v1665_v40 = vmax.f32 %v1584_v34, 0.0  ;;  %v3352_v34 = vld [vmem:[%s4615_s3 + $0x1c8] sm:$0xff]  }
 0x21b   : > { %v1920_v59 = vrot.slane %v1898_v4, %v3788_v23  ;;  %v1734_v37 = vmin.f32 %v1654_v0, 6.0  ;;  %v1735_v14 = vmin.f32 %v1655_v28, 6.0  ;;  %v1936_v49 = vrot.slane %v1928_v17, %v3788_v23  ;;  %v3354_v28 = vld [vmem:[%s4615_s3 + $0x150] sm:$0xff]  }
 0x21c   : > { %v1867_v33 = vadd.f32 %v1866_v11, %v1725_v18  ;;  %v1744_v19 = vmin.f32 %v1664_v50, 6.0  ;;  %v1745_v53 = vmin.f32 %v1665_v40, 6.0  ;;  %v3464_v62 = vmov 1983009808   ;;  %v3358_v50 = vld [vmem:[%s4615_s3 + $0x158] sm:$0xff]  }
 0x21d   : > { %v1929_v43 = vcombine.low %v1920_v59, %v1927_v15  ;;  %v1855_v38 = vadd.f32 %v1854_v1, %v1734_v37  ;;  %v1974_v44 = vunpack.c.l.s4 %v3464_v62  ;;  %v3351_v1 = vld [vmem:[%s4615_s3 + $0x108] sm:$0xff]   ;;  %v3355_v59 = vld [vmem:[%s4615_s3 + $0x110] sm:$0xff]   ;;  %v3360_v40 = vld [vmem:[%s4615_s3 + $0x1d8] sm:$0xff]  }
 0x21e   : > { %v1868_v22 = vadd.f32 %v1867_v33, %v1735_v14  ;;  %v3353_v15 = vld [vmem:[%s4615_s3 + $0x188] sm:$0xff]   ;;  %v3359_v33 = vld [vmem:[%s4615_s3 + $0x118] sm:$0xff]   ;;  %v3362_v37 = vld [vmem:[%s4615_s3 + $0x160] sm:$0xff]  }
 0x21f   : > { %v1943_v56 = vrot.slane %v1929_v43, %v3788_v23  ;;  %v1856_v27 = vadd.f32 %v1855_v38, %v1744_v19  ;;  %v1975_v10 = vunpack.c.0.s8 %v1974_v44  ;;  %v3361_v14 = vld [vmem:[%s4615_s3 + $0x198] sm:$0xff]   ;;  %v3364_v43 = vld [vmem:[%s4615_s3 + $0x1e0] sm:$0xff]   ;;  %v3369_v62 = vld [vmem:[%s4615_s3 + $0x1a8] sm:$0xff]  }
 0x220   : > { %v1869_v36 = vadd.f32 %v1868_v22, %v1745_v53  ;;  %v3363_v19 = vld [vmem:[%s4615_s3 + $0x120] sm:$0xff]   ;;  %v3366_v53 = vld [vmem:[%s4615_s3 + $0x168] sm:$0xff]   ;;  %v3372_v44 = vld [vmem:[%s4615_s3 + $0x1f0] sm:$0xff]  }
 0x221   : > { %v1944_v12 = vcombine.low %v1936_v49, %v1943_v56  ;;  %v1857_v30 = vrot.slane %v1856_v27, 4  ;;  %v1978_v2 = vsub.s32 %v1975_v10, %v3748_v42  ;;  %v3365_v38 = vld [vmem:[%s4615_s3 + $0x1a0] sm:$0xff]   ;;  %v3368_v22 = vld [vmem:[%s4615_s3 + $0x1e8] sm:$0xff]   ;;  %v3370_v56 = vld [vmem:[%s4615_s3 + $0x170] sm:$0xff]  }
 0x222   : > { %v1870_v5 = vrot.slane %v1869_v36, 4  ;;  %v3367_v49 = vld [vmem:[%s4615_s3 + $0x128] sm:$0xff]   ;;  %v3375_v10 = vld [vmem:[%s4615_s3 + $0x138] sm:$0xff]  }
 0x223   : > { %1963 = vst [vmem:[#allocation2 + $0x1] ss:$2 sm:$0xff] %v1944_v12  ;;  %v1858_v6 = vadd.f32 %v1857_v30, %v1856_v27  ;;  %v3371_v27 = vld [vmem:[%s4615_s3 + $0x130] sm:$0xff]   ;;  %v3376_v30 = vld [vmem:[%s4615_s3 + $0x1f8] sm:$0xff]  }
 0x224   : > { %v1871_v63 = vadd.f32 %v1870_v5, %v1869_v36  ;;  %v3374_v36 = vld [vmem:[%s4615_s3 + $0x178] sm:$0xff]   ;;  %v3373_v12 = vld [vmem:[%s4615_s3 + $0x1b0] sm:$0xff]  }
 0x225   : > { %v1859_v3 = vrot.slane %v1858_v6, 2 }
 0x226   : > { %v1872_v26 = vrot.slane %v1871_v63, 2 }
 0x227   : > { %v1860_v55 = vadd.f32 %v1859_v3, %v1858_v6  ;;  %v3378_v6 = vld [vmem:[%s4615_s3 + $0x240] sm:$0xff]  }
 0x228   : > { %v1873_v57 = vadd.f32 %v1872_v26, %v1871_v63  ;;  %v3377_v63 = vld [vmem:[%s4615_s3 + $0x1b8] sm:$0xff]   ;;  %v3379_v26 = vld [vmem:[%s4615_s3 + $0x200] sm:$0xff]  }
 0x229   : > { %v1861_v41 = vrot.slane %v1860_v55, 1 }
 0x22a   : > { %v1874_v17 = vrot.slane %v1873_v57, 1  ;;  %v1966_v20 = vld [vmem:[#allocation2] sm:$0xff]  ;;  %v1967_v21 = vld [vmem:[#allocation2 + $0x8] sm:$0xff] }
 0x22b   : > { %v1979_v39 = vrot.slane %v1966_v20, %v1978_v2  ;;  %v1972_v13 = vcombine.high %v1966_v20, %v1966_v20  ;;  %v4408_v46 = vrot.slane %v1967_v21, %v1978_v2  ;;  %v1989_v7 = vcombine.high %v1967_v21, %v1967_v21  ;;  %v3382_v20 = vld [vmem:[%s4615_s3 + $0x250] sm:$0xff]  }
 0x22c   : > { %v1862_v25 = vadd.f32 %v1861_v41, %v1860_v55  ;;  %v1875_v58 = vadd.f32 %v1874_v17, %v1873_v57  ;;  %v3380_v55 = vld [vmem:[%s4615_s3 + $0x248] sm:$0xff]   ;;  %v3383_v21 = vld [vmem:[%s4615_s3 + $0x210] sm:$0xff]  }
 0x22d   : > { %v1987_v9 = vcombine.high %v1979_v39, %v1979_v39  ;;  %v1986_v48 = vrot.slane %v1972_v13, %v1978_v2  ;;  %v2004_v42 = vcombine.high %v4408_v46, %v4408_v46  ;;  %v4412_v61 = vrot.slane %v1989_v7, %v1978_v2  ;;  %v3381_v17 = vld [vmem:[%s4615_s3 + $0x208] sm:$0xff]   ;;  %v3385_v13 = vld [vmem:[%s4615_s3 + $0x218] sm:$0xff]   ;;  %v3387_v7 = vld [vmem:[%s4615_s3 + $0x220] sm:$0xff]  }
 0x22e   : > { %v1884_v29 = vmul.f32 0.015625, %v1862_v25  ;;  %v1885_v16 = vmul.f32 0.015625, %v1875_v58  ;;  %v2024_v52 = vpack.c.bf16 %v1979_v39, %v1979_v39  ;;  %v2028_v2 = vpack.c.bf16 %v4408_v46, %v4408_v46  ;;  %v3384_v39 = vld [vmem:[%s4615_s3 + $0x258] sm:$0xff]   ;;  %v3386_v46 = vld [vmem:[%s4615_s3 + $0x260] sm:$0xff]   ;;  %v3388_v25 = vld [vmem:[%s4615_s3 + $0x268] sm:$0xff]  }
 0x22f   : > { %v2025_v24 = vpack.c.bf16 %v1987_v9, %v1987_v9  ;;  %v1988_v54 = vcombine.high %v1986_v48, %v1986_v48  ;;  %v2005_v8 = vcombine.high %v4412_v61, %v4412_v61  ;;  %v2026_v11 = vpack.c.bf16 %v1986_v48, %v1986_v48  ;;  %v3389_v58 = vld [vmem:[%s4615_s3 + $0x228] sm:$0xff]   ;;  %v3390_v9 = vld [vmem:[%s4615_s3 + $0x270] sm:$0xff]  }
 0x230   : > { %v1945_v31 = vcombine.low %v1884_v29, %v1885_v16  ;;  %v2029_v60 = vpack.c.bf16 %v2004_v42, %v2004_v42  ;;  %v2030_v41 = vpack.c.bf16 %v4412_v61, %v4412_v61  ;;  %v3391_v48 = vld [vmem:[%s4615_s3 + $0x230] sm:$0xff]   ;;  %v3392_v29 = vld [vmem:[%s4615_s3 + $0x278] sm:$0xff]  }
 0x231   : > { %2713 = vmatprep.mubr.bf16.mxu0 %v2025_v24  ;;  %v2027_v32 = vpack.c.bf16 %v1988_v54, %v1988_v54  ;;  %v2031_v0 = vpack.c.bf16 %v2005_v8, %v2005_v8  ;;  %v3393_v16 = vld [vmem:[%s4615_s3 + $0x238] sm:$0xff]   ;;  %v3040_v24 = vld [vmem:[%s4616_s4] ss:$0 sm:$0xff] }
 0x232   : > { %v1952_v4 = vrot.slane %v1945_v31, %v3788_v23  ;;  %2714 = vmatmul.mubr.bf16.vlgmr.msra.gmra.mrb[72].mxu0 %v2024_v52 }
 0x233   : > { %3171 = vmatpush3.bf16.msra.mxu0 %v3345_v45  ;;  %2753 = vmatprep.mubr.bf16.mxu1 %v2027_v32 }
 0x234   : > { %v1959_v18 = vrot.slane %v1952_v4, %v3788_v23  ;;  %2793 = vmatprep.mubr.bf16.mxu0 %v2029_v60  ;;  %2754 = vmatmul.mubr.bf16.vlgmr.msra.gmra.mrb[88].mxu1 %v2026_v11  ;;  %v3356_v23 = vld [vmem:[%s4615_s3 + $0x1d0] sm:$0xff]  }
 0x235   : > { %3193 = vmatpush3.bf16.msra.mxu1 %v3348_v35  ;;  %3172 = vmatprep.subr.bf16.mxu0 %v3349_v47 }
 0x236   : > { %1965 = vst.msk [vmem:[#allocation2 + $0x11] ss:$2 sm:$0x3] %vm4126_vm1, %v1959_v18  ;;  %2833 = vmatprep.mubr.bf16.mxu1 %v2031_v0  ;;  %3194 = vmatprep.subr.bf16.mxu1 %v3352_v34 }
 0x237   : > { %3173 = vmatpush3.bf16.msra.mxu0 %v3351_v1 }
 0x238   : > { %3174 = vmatprep.subr.bf16.mxu0 %v3354_v28 }
 0x239   : > { %3195 = vmatpush3.bf16.msra.mxu1 %v3353_v15 }
 0x23a   : > { %3196 = vmatprep.subr.bf16.mxu1 %v3356_v23 }
 0x23b   : > { %3175 = vmatpush3.bf16.msra.mxu0 %v3355_v59 }
 0x23c   : > { %3176 = vmatprep.subr.bf16.mxu0 %v3358_v50 }
 0x23d   : > { %3197 = vmatpush3.bf16.msra.mxu1 %v3357_v51  ;;  %v3039_v5 = vld.sshfl [vmem:[#allocation2 + $0x10] sm:$0x33 pattern:$0x76325410] }
 0x23e   : > { %3198 = vmatprep.subr.bf16.mxu1 %v3360_v40  ;;  %v2013_v3 = vcombine.high %v3039_v5, %v3039_v5  ;;  %v2032_v42 = vpack.c.bf16 %v3039_v5, %v3039_v5 }
 0x23f   : > { %3177 = vmatpush3.bf16.msra.mxu0 %v3359_v33 }
 0x240   : > { %3178 = vmatprep.subr.bf16.mxu0 %v3362_v37  ;;  %v2033_v57 = vpack.c.bf16 %v2013_v3, %v2013_v3 }
 0x241   : > { %3199 = vmatpush3.bf16.msra.mxu1 %v3361_v14 }
 0x242   : > { %3200 = vmatprep.subr.bf16.mxu1 %v3364_v43 }
 0x243   : > { %3179 = vmatpush3.bf16.msra.mxu0 %v3363_v19 }
 0x244   : > { %3180 = vmatprep.subr.bf16.mxu0 %v3366_v53 }
 0x245   : > { %3201 = vmatpush3.bf16.msra.mxu1 %v3365_v38 }
 0x246   : > { %3202 = vmatprep.subr.bf16.mxu1 %v3368_v22 }
 0x247   : > { %3181 = vmatpush3.bf16.msra.mxu0 %v3367_v49 }
 0x248   : > { %3182 = vmatprep.subr.bf16.mxu0 %v3370_v56 }
 0x249   : > { %3203 = vmatpush3.bf16.msra.mxu1 %v3369_v62 }
 0x24a   : > { %3204 = vmatprep.subr.bf16.mxu1 %v3372_v44 }
 0x24b   : > { %3183 = vmatpush3.bf16.msra.mxu0 %v3371_v27 }
 0x24c   : > { %3184 = vmatprep.subr.bf16.mxu0 %v3374_v36 }
 0x24d   : > { %3205 = vmatpush3.bf16.msra.mxu1 %v3373_v12 }
 0x24e   : > { %3206 = vmatprep.subr.bf16.mxu1 %v3376_v30 }
 0x24f   : > { %3185 = vmatpush3.bf16.msra.mxu0 %v3375_v10 }
 0x250   : > { %3214 = vmatprep.subr.bf16.mxu0 %v3378_v6 }
 0x251   : > { %3207 = vmatpush3.bf16.msra.mxu1 %v3377_v63 }
 0x252   : > { %2794 = vmatmul.mubr.bf16.vlgmr.msra.gmra.mrb[76].mxu0 %v2028_v2 }
 0x253   : > { %3215 = vmatpush3.bf16.msra.mxu0 %v3379_v26  ;;  %2873 = vmatprep.mubr.bf16.mxu0 %v2033_v57 }
 0x254   : > { %2834 = vmatmul.mubr.bf16.vlgmr.msra.gmra.mrb[92].mxu1 %v2030_v41  ;;  %3216 = vmatprep.subr.bf16.mxu0 %v3380_v55 }
 0x257   : > { %3217 = vmatpush3.bf16.msra.mxu0 %v3381_v17 }
 0x258   : > { %3218 = vmatprep.subr.bf16.mxu0 %v3382_v20 }
 0x25b   : > { %3219 = vmatpush3.bf16.msra.mxu0 %v3383_v21 }
 0x25c   : > { %3220 = vmatprep.subr.bf16.mxu0 %v3384_v39 }
 0x25f   : > { %3221 = vmatpush3.bf16.msra.mxu0 %v3385_v13 }
 0x260   : > { %3222 = vmatprep.subr.bf16.mxu0 %v3386_v46 }
 0x263   : > { %3223 = vmatpush3.bf16.msra.mxu0 %v3387_v7 }
 0x264   : > { %3224 = vmatprep.subr.bf16.mxu0 %v3388_v25 }
 0x267   : > { %3225 = vmatpush3.bf16.msra.mxu0 %v3389_v58 }
 0x268   : > { %3226 = vmatprep.subr.bf16.mxu0 %v3390_v9 }
 0x26b   : > { %3227 = vmatpush3.bf16.msra.mxu0 %v3391_v48 }
 0x26c   : > { %3228 = vmatprep.subr.bf16.mxu0 %v3392_v29 }
 0x26f   : > { %3229 = vmatpush3.bf16.msra.mxu0 %v3393_v16 }
 0x272   : > { %2874 = vmatmul.mubr.bf16.vlgmr.msra.gmra.mrb[80].mxu0 %v2032_v42 }
 0x305   : > { %v3142_v61 = vpop.f32.mrb[72].mxu0 }
 0x306   : > { %v3143_v45 = vpop.f32.mrb[73].mxu0 }
 0x307   : > { %v3144_v54 = vadd.f32 %v3143_v45, %v3142_v61  ;;  %v3145_v31 = vpop.f32.mrb[74].mxu0  ;;  %v3164_v52 = vpop.f32.mrb[88].mxu1 }
 0x308   : > { %v3146_v8 = vpop.f32.mrb[75].mxu0  ;;  %v3165_v32 = vpop.f32.mrb[89].mxu1 }
 0x309   : > { %v2716_v35 = vadd.f32 %v3144_v54, %v3040_v24  ;;  %v3166_v47 = vadd.f32 %v3165_v32, %v3164_v52  ;;  %v3167_v4 = vpop.f32.mrb[90].mxu1 }
 0x30a   : > { %v3168_v11 = vpop.f32.mrb[91].mxu1 }
 0x30b   : > { %v2756_v60 = vadd.f32 %v3166_v47, %v2716_v35 }
 0x325   : > { %v3186_v34 = vpop.f32.mrb[76].mxu0 }
 0x326   : > { %v3187_v1 = vpop.f32.mrb[77].mxu0 }
 0x327   : > { %v3188_v18 = vadd.f32 %v3187_v1, %v3186_v34  ;;  %v3189_v0 = vpop.f32.mrb[78].mxu0  ;;  %v3208_v28 = vpop.f32.mrb[92].mxu1 }
 0x328   : > { %v3190_v15 = vpop.f32.mrb[79].mxu0  ;;  %v3209_v23 = vpop.f32.mrb[93].mxu1 }
 0x329   : > { %v2796_v59 = vadd.f32 %v3188_v18, %v2756_v60  ;;  %v3210_v50 = vadd.f32 %v3209_v23, %v3208_v28  ;;  %v3211_v51 = vpop.f32.mrb[94].mxu1 }
 0x32a   : > { %v3212_v40 = vpop.f32.mrb[95].mxu1 }
 0x32b   : > { %v2836_v33 = vadd.f32 %v3210_v50, %v2796_v59 }
 0x345   : > { %v3230_v37 = vpop.f32.mrb[80].mxu0 }
 0x346   : > { %v3231_v14 = vpop.f32.mrb[81].mxu0 }
 0x347   : > { %v3232_v43 = vadd.f32 %v3231_v14, %v3230_v37  ;;  %v3233_v19 = vpop.f32.mrb[82].mxu0 }
 0x348   : > { %v3234_v53 = vpop.f32.mrb[83].mxu0 }
 0x349   : > { %v2876_v38 = vadd.f32 %v3232_v43, %v2836_v33 }
 0x34b   : > { %v2882_v22 = vsel %vm2881_vm2, %v2876_v38, -inf }
 0x34c   : > { %2883 = vmax.xlane.f32.xlu0 %v2882_v22 }
 0x3d9   : > { %v2884_v49 = vpop.xlane.xlu0 %2883 }
 0x3da   : > { %v2885_v56 = vsub.f32 %v2876_v38, %v2884_v49 }
 0x3dc   : > { %v2886_v62 = vmul.f32 1.442695, %v2885_v56 }
 0x3de   : > { %3394 = vpow2.f32 %v2886_v62 }
 0x3e8   : > { %v3395_v44 = vpop.eup %3394 }
 0x3e9   : > { %v2888_v27 = vsel %vm2881_vm2, %v3395_v44, 0.0 }
 0x3ea   : > { %2889 = vadd.xlane.f32.xlu1 %v2888_v27 }
 0x477   : > { %v2890_v36 = vpop.xlane.xlu1 %2889 }
 0x478   : > { %3396 = vrcp.f32 %v2890_v36 }
 0x482   : > { %v3397_v12 = vpop.eup %3396 }
 0x483   : > { %v2892_v30 = vmul.f32 %v3397_v12, %v3395_v44 }
 0x485   : > { %2893 = vst [vmem:[%s220_s11] sm:$0x3] %v2892_v30 }
 0x486   : > { %3411 = shalt.err (!%p3408_p3)
}
 0x487   : > { %s3412_s26 = scalar_lea.hbm %s4570_s15, 32  ;;  %s3416_s7 = scalar_lea.hbm %s4617_s5, 64 }
 0x488   : > { %p3413_p4 = scmp.ne.s32.totalorder %s4570_s15, %s3412_s26  ;;  %p3417_p9 = scmp.lt.u32.totalorder %s4570_s15, %s4617_s5 }
 0x489   : > { %p3418_p10 = scmp.lt.u32.totalorder %s3416_s7, %s3412_s26  ;;  %p3420_p12 = scmp.lt.u32.totalorder %s3412_s26, %s4570_s15 }
 0x48a   : > { %p3414_p7 = pnand %p3413_p4, %p3534_p5 }
 0x48b   : > { %p3419_p11 = por %p3418_p10, %p3417_p9 }
 0x48c   : > { %p3415_p8 = pneg %p3414_p7 }
 0x48d   : > { %p3421_p13 = por %p3420_p12, %p3419_p11 }
 0x48f   : > { %p3422_p0 = pnand %p3421_p13, %p3415_p8 }
 0x491   : > { %3425 = shalt.err (!%p3422_p0)
}
 0x492   : > { %3240 = dma.vmem_to_hbm [thread:$0]  (%p3534_p5), %s4572_s12, 32, %s4570_s15, %s2895_s16  }
 0x493 PF: > { %p3246_p1 = scmp.ge.s32.totalorder %s3460_s21, 2  ;;  %s2920_s10 = sand.u32 1, %s3448_s18  }
 0x494   : > { %s2921_s11 = scalar_lea.sflag [#allocation4], %s2920_s10 }
 0x495   : > { %p3243_p2 = pnand %p3246_p1, %p3538_p6 }
 0x497   : > { %3443 = dma.done.wait (!%p3243_p2), %s2921_s11, 32  }
 0x498   : > { %3445 = vsyncadd (!%p3243_p2), %s2921_s11, 4294967264  ;;  %p15_p3 = scmp.ge.s32.totalorder %s3521_s24, 4   ;;  %s4622_s18 = smov %s3452_s19 }
 0x499   : > { %s4623_s19 = smov %s3456_s20  ;;  %s4624_s20 = smov %s3532_s27 }
 0x49a   : > { %s4625_s21 = smov %s3521_s24  ;;  %17 = sbr.rel (!%p15_p3) target bundleno = 3 (0x3), region = 79 }
 0x4a1   :  { %2926 = vsyncpa [#allocation4], 1 }
 0x4a2   :  { %2928 = vsyncpa [#allocation4 + $0x1], 1 }

</bundles_post_ra>
